<compile_context>
chip_gen: v6e
topology: v6e:2x2x1
jax: 0.10.0
libtpu: 0.0.40
codegen_flags: <defaults>
</compile_context>

<pallas_src>
import functools

import jax
import jax.numpy as jnp
from jax.experimental import pallas as pl
from jax.experimental.pallas import tpu as pltpu

NUM_BRANCHES = 4
N_CLASS = 100
_LANE = 128
_SUBLANE = 8
_HIGHEST = jax.lax.Precision.HIGHEST


def _round_up(x, m):
    return ((x + m - 1) // m) * m


# ----------------------------------------------------------------------------
# Generation-aware tiling heuristics
# ----------------------------------------------------------------------------
def _vmem_limit_and_budget():
    """(vmem_limit_bytes for the compiler, planning budget for block picks)."""
    try:
        cap = int(pltpu.get_tpu_info().vmem_capacity_bytes)
    except Exception:
        cap = 64 * 1024 * 1024            # conservative: v7x per-TensorCore VMEM
    limit = min(cap * 3 // 4, 96 * 1024 * 1024)   # 96 MiB on v5e/v6e, 48 MiB on v7x
    limit = max(limit, 32 * 1024 * 1024)
    budget = int(limit * 0.85)            # headroom for compiler-internal scratch
    return limit, budget


def _estimate_vmem(tt, bb, h0p, h1p):
    f32 = 4
    b0 = 2 * tt * bb * h0p * f32                 # streamed input, double-buffered
    w1 = 2 * h0p * h1p * f32                     # grid-invariant, still 2 buffers
    gates = 2 * 2 * (h0p + h1p) * f32
    minit = 2 * bb * (h0p + h1p) * f32
    outb = 2 * bb * h1p * f32
    scratch = 3 * bb * (h0p + h1p) * f32         # d/m/s for both layers
    return b0 + w1 + gates + minit + outb + scratch


def _pick_time_block(T, n_avg, cap):
    """Pick Tt <= cap; prefer (fewest grid steps, least padding, averaging
    window contained in the final block, largest Tt)."""
    best_key, best_tt, best_tpad = None, 1, T
    for tt in range(1, max(1, cap) + 1):
        steps = -(-T // tt)
        t_pad = steps * tt
        pad = t_pad - T
        window_in_last = (pad + n_avg) <= tt
        key = (steps, pad, 0 if window_in_last else 1, -tt)
        if best_key is None or key < best_key:
            best_key, best_tt, best_tpad = key, tt, t_pad
    return best_tt, best_tpad


def _select_blocks(T, n_avg, Bp, h0p, h1p, budget):
    """VMEM-budget-aware co-selection of (Tt, T_pad, BB)."""
    BB = 8
    for cand in (128, 64, 32, 16, 8):
        if Bp % cand == 0:
            BB = cand
            break
    # Keep >= 2 blocks on the parallel batch axis when possible so both v7x
    # TensorCores get work (no-op on 1-TC chips).
    if Bp // BB < 2 and BB % 16 == 0:
        BB //= 2

    while True:
        for cap in (32, 16, 8, 4, 2, 1):
            tt, t_pad = _pick_time_block(T, n_avg, cap)
            if _estimate_vmem(tt, BB, h0p, h1p) <= budget:
                return tt, t_pad, BB
        if BB % 16 == 0:
            BB //= 2
        else:
            # Smallest configuration even if over budget; compiler arbitrates.
            tt, t_pad = _pick_time_block(T, n_avg, 1)
            return tt, t_pad, BB


def _pick_unroll(tt, bb, h0p, h1p):
    """Full unroll only for small carried state; partial unroll otherwise
    (keeps LLO scheduling visibility without blowing up live ranges)."""
    state_elems = bb * 3 * (h0p + h1p)
    if state_elems <= 16 * 1024:
        return max(1, tt)
    return max(1, min(4, tt))


# ----------------------------------------------------------------------------
# Kernel: recurrent part only (gating + layer-1 matmul + spike-mean window).
# ----------------------------------------------------------------------------
def dh_snn_recurrent_kernel(b0_ref, beta0_ref, alpha0_ref, beta1_ref, alpha1_ref,
                            w1_ref, m0_init_ref, m1_init_ref,
                            out_ref,
                            d0_ref, m0_ref, s0_ref, d1_ref, m1_ref, s1_ref,
                            *, time_block, total_steps, first_avg_t, avg_scale,
                            acc_block_start, num_time_blocks, unroll):
    ti = pl.program_id(1)                 # time-block index (sequential axis)
    multi_acc = acc_block_start < num_time_blocks - 1   # static

    @pl.when(ti == 0)
    def _init():
        d0_ref[...] = jnp.zeros_like(d0_ref)
        m0_ref[...] = m0_init_ref[...]
        s0_ref[...] = jnp.zeros_like(s0_ref)
        d1_ref[...] = jnp.zeros_like(d1_ref)
        m1_ref[...] = m1_init_ref[...]
        s1_ref[...] = jnp.zeros_like(s1_ref)
        if multi_acc:                     # only needed when several blocks RMW
            out_ref[...] = jnp.zeros_like(out_ref)

    # Loop-invariant gates / weight: loaded once per grid step.
    beta0 = beta0_ref[...]
    gamma0 = 1.0 - beta0
    alpha0 = alpha0_ref[...]
    rho0 = 1.0 - alpha0
    beta1 = beta1_ref[...]
    gamma1 = 1.0 - beta1
    alpha1 = alpha1_ref[...]
    rho1 = 1.0 - alpha1
    w1 = w1_ref[...]                      # block-diagonal (H0p, H1p) layer-1 weight

    t_base = ti * time_block

    def surrogate(x):
        # Forward of surrogate_gradient: 1 if x > 0 else 0.5*tanh(2x).
        return jnp.where(x > 0, jnp.float32(1.0), 0.5 * jnp.tanh(2.0 * x))

    def run_block(accumulate):
        def step(i, carry):
            if accumulate:
                d0, m0, s0, d1, m1, s1, acc = carry
            else:
                d0, m0, s0, d1, m1, s1 = carry
            b0 = b0_ref[i]                                       # (BB, H0p)
            # Layer 0 (state-free branch matmul already hoisted to XLA)
            d0 = beta0 * d0 + gamma0 * b0
            m0 = alpha0 * m0 + rho0 * d0 - s0
            s0 = surrogate(m0 - 1.0)
            # Layer 1: one lane-dense matmul against the block-diag weight
            b1 = jnp.dot(s0, w1, preferred_element_type=jnp.float32)
            d1 = beta1 * d1 + gamma1 * b1
            m1 = alpha1 * m1 + rho1 * d1 - s1
            s1 = surrogate(m1 - 1.0)
            if accumulate:
                tg = t_base + i
                wgt = jnp.where((tg >= first_avg_t) & (tg < total_steps),
                                jnp.float32(avg_scale), jnp.float32(0.0))
                acc = acc + wgt * s1
                return d0, m0, s0, d1, m1, s1, acc
            return d0, m0, s0, d1, m1, s1

        state0 = (d0_ref[...], m0_ref[...], s0_ref[...],
                  d1_ref[...], m1_ref[...], s1_ref[...])
        init = state0 + ((jnp.zeros(out_ref.shape, out_ref.dtype),)
                         if accumulate else ())
        res = jax.lax.fori_loop(0, time_block, step, init, unroll=unroll)
        d0_ref[...] = res[0]
        m0_ref[...] = res[1]
        s0_ref[...] = res[2]
        d1_ref[...] = res[3]
        m1_ref[...] = res[4]
        s1_ref[...] = res[5]
        return res[6] if accumulate else None

    if num_time_blocks == 1:
        # Single time block: no branching, plain store of the spike mean.
        out_ref[...] = run_block(True)
    else:
        @pl.when(ti < acc_block_start)
        def _no_acc():                     # cheaper body, no output touch
            run_block(False)

        @pl.when(ti >= acc_block_start)
        def _with_acc():
            acc = run_block(True)
            if not multi_acc:
                out_ref[...] = acc         # window in final block: plain store
            else:
                out_ref[...] += acc        # window straddles blocks: accumulate


# ----------------------------------------------------------------------------
# Wrapper
# ----------------------------------------------------------------------------
def neurovpr_dh_snn_forward(dvs_input, params, mem_inits):
    """dvs_input: (B, T, C, H, W) float32.  Returns (B, N_CLASS) float32."""
    B, T, C, Hh, Ww = dvs_input.shape
    D = C * Hh * Ww
    NB = NUM_BRANCHES
    w0, tn0, tm0, w1, tn1, tm1, wo, bo = params
    m0_init, m1_init = mem_inits
    H0, H1 = tm0.shape[-1], tm1.shape[-1]
    Db0, Hb0, Hb1 = D // NB, H0 // NB, H1 // NB

    # ---- hoisted layer-0 branch matmul (no dependence on carried state) ----
    # Emits time-major (T, B, NB, Hb0) directly; f32/HIGHEST kept for
    # bit-faithful semantics (see TODO at file top re: bf16 / default prec.).
    x4 = dvs_input.reshape(B, T, NB, Db0).astype(jnp.float32)
    b0 = jnp.einsum('btnd,ndh->tbnh', x4, w0, precision=_HIGHEST)
    b0 = b0.reshape(T, B, H0)

    # ---- hardware padding (lane = 128, sublane = 8) ----
    Bp = _round_up(B, _SUBLANE)
    H0p = _round_up(H0, _LANE)
    H1p = _round_up(H1, _LANE)

    # ---- generation-aware block selection ----
    n_avg = min(3, T)
    vmem_limit, budget = _vmem_limit_and_budget()
    Tt, T_pad, BB = _select_blocks(T, n_avg, Bp, H0p, H1p, budget)
    num_tblocks = T_pad // Tt
    acc_block_start = (T - n_avg) // Tt
    unroll = _pick_unroll(Tt, BB, H0p, H1p)

    # ---- pad arrays (padded time steps carry zero current; padded lanes have
    #      zero gates/weights, padded batch rows are sliced off) ----
    b0 = jnp.pad(b0, ((0, T_pad - T), (0, Bp - B), (0, H0p - H0)))
    m0p = jnp.pad(m0_init.astype(jnp.float32), ((0, Bp - B), (0, H0p - H0)))
    m1p = jnp.pad(m1_init.astype(jnp.float32), ((0, Bp - B), (0, H1p - H1)))

    def _branch_gate(tau_n, H, Hb, Hp):
        segs = [jax.nn.sigmoid(tau_n[j, j * Hb:(j + 1) * Hb]) for j in range(NB)]
        g = jnp.concatenate(segs)[None, :]
        return jnp.pad(g, ((0, 0), (0, Hp - H)))

    beta0 = _branch_gate(tn0, H0, Hb0, H0p)
    beta1 = _branch_gate(tn1, H1, Hb1, H1p)
    alpha0 = jnp.pad(jax.nn.sigmoid(tm0.reshape(1, H0)), ((0, 0), (0, H0p - H0)))
    alpha1 = jnp.pad(jax.nn.sigmoid(tm1.reshape(1, H1)), ((0, 0), (0, H1p - H1)))

    # ---- layer-1 branch weights fused into one block-diagonal matrix ----
    w1_bd = jax.scipy.linalg.block_diag(*[w1[j] for j in range(NB)])   # (H0, H1)
    w1_bd = jnp.pad(w1_bd, ((0, H0p - H0), (0, H1p - H1))).astype(jnp.float32)

    kernel = functools.partial(
        dh_snn_recurrent_kernel,
        time_block=Tt, total_steps=T, first_avg_t=T - n_avg,
        avg_scale=1.0 / n_avg, acc_block_start=acc_block_start,
        num_time_blocks=num_tblocks, unroll=unroll)

    c2 = lambda bi, ti: (0, 0)
    cb = lambda bi, ti: (bi, 0)

    spike_mean = pl.pallas_call(
        kernel,
        out_shape=jax.ShapeDtypeStruct((Bp, H1p), jnp.float32),
        grid_spec=pltpu.PrefetchScalarGridSpec(
            num_scalar_prefetch=0,
            grid=(Bp // BB, T_pad // Tt),
            in_specs=[
                pl.BlockSpec((Tt, BB, H0p), lambda bi, ti: (ti, bi, 0)),   # b0
                pl.BlockSpec((1, H0p), c2),                                # beta0
                pl.BlockSpec((1, H0p), c2),                                # alpha0
                pl.BlockSpec((1, H1p), c2),                                # beta1
                pl.BlockSpec((1, H1p), c2),                                # alpha1
                pl.BlockSpec((H0p, H1p), c2),                              # w1 (bd)
                pl.BlockSpec((BB, H0p), cb),                               # m0 init
                pl.BlockSpec((BB, H1p), cb),                               # m1 init
            ],
            out_specs=pl.BlockSpec((BB, H1p), cb),          # resident accumulator
            scratch_shapes=[
                pltpu.VMEM((BB, H0p), jnp.float32),         # d0
                pltpu.VMEM((BB, H0p), jnp.float32),         # m0
                pltpu.VMEM((BB, H0p), jnp.float32),         # s0
                pltpu.VMEM((BB, H1p), jnp.float32),         # d1
                pltpu.VMEM((BB, H1p), jnp.float32),         # m1
                pltpu.VMEM((BB, H1p), jnp.float32),         # s1
            ],
        ),
        compiler_params=pltpu.CompilerParams(
            dimension_semantics=("parallel", "arbitrary"),
            vmem_limit_bytes=vmem_limit,
        ),
    )(b0, beta0, alpha0, beta1, alpha1, w1_bd, m0p, m1p)

    # ---- classifier hoisted out of the kernel (affine commutes with mean) ----
    s1_mean = spike_mean[:B, :H1]
    return jnp.dot(s1_mean, wo, precision=_HIGHEST) + bo


# ----------------------------------------------------------------------------
# Deterministic parameter init (mimics the module's __init__ shapes)
# ----------------------------------------------------------------------------
def init_params(key, input_dim, hidden_dims, output_dim, nb=NUM_BRANCHES):
    ks = list(jax.random.split(key, 3 * len(hidden_dims) + 2))
    params = []
    cur = input_dim
    ki = 0
    for hd in hidden_dims:
        Db, Hb = cur // nb, hd // nb
        bound = 1.0 / float(Db) ** 0.5
        # branch Linear weights (no bias), stored transposed: (NB, Db, Hb)
        w = jax.random.uniform(ks[ki], (nb, Db, Hb), jnp.float32, -bound, bound); ki += 1
        tn = jax.random.uniform(ks[ki], (nb, hd), jnp.float32, 0.0, 4.0); ki += 1
        tm = jax.random.uniform(ks[ki], (1, hd), jnp.float32, 0.0, 4.0); ki += 1
        params += [w, tn, tm]
        cur = hd
    bound = 1.0 / float(cur) ** 0.5
    wo = jax.random.uniform(ks[ki], (cur, output_dim), jnp.float32, -bound, bound); ki += 1
    bo = jax.random.uniform(ks[ki], (1, output_dim), jnp.float32, -bound, bound); ki += 1
    params += [wo, bo]                    # <-- fix: classifier params were dropped
    return tuple(params)


# ----------------------------------------------------------------------------
# Plain-JAX reference for correctness check
# ----------------------------------------------------------------------------
def reference_forward(dvs_input, params, mem_inits):
    B, T, C, Hh, Ww = dvs_input.shape
    D = C * Hh * Ww
    x_seq = dvs_input.reshape(B, T, D).astype(jnp.float32)
    w0, tn0, tm0, w1, tn1, tm1, wo, bo = params
    m0, m1 = mem_inits
    NB = NUM_BRANCHES
    H0, H1 = tm0.shape[-1], tm1.shape[-1]
    d0 = jnp.zeros((NB, B, H0 // NB), jnp.float32); s0 = jnp.zeros((B, H0), jnp.float32)
    d1 = jnp.zeros((NB, B, H1 // NB), jnp.float32); s1 = jnp.zeros((B, H1), jnp.float32)

    def layer(x, w, tn, tm, d, m, s):
        Db = x.shape[1] // NB
        Hb = w.shape[2]
        dn = []
        for j in range(NB):
            bi = jnp.dot(x[:, j * Db:(j + 1) * Db], w[j], precision=_HIGHEST)
            beta = jax.nn.sigmoid(tn[j, j * Hb:(j + 1) * Hb])
            dn.append(beta * d[j] + (1.0 - beta) * bi)
        total = jnp.concatenate(dn, axis=1)
        alpha = jax.nn.sigmoid(tm[0])
        m = alpha * m + (1.0 - alpha) * total - s
        si = m - 1.0
        s = jnp.where(si > 0, 1.0, 0.5 * jnp.tanh(2.0 * si))
        return jnp.stack(dn), m, s

    outs = []
    for t in range(T):
        x = x_seq[:, t]
        d0, m0, s0 = layer(x, w0, tn0, tm0, d0, m0, s0)
        d1, m1, s1 = layer(s0, w1, tn1, tm1, d1, m1, s1)
        outs.append(jnp.dot(s1, wo, precision=_HIGHEST) + bo)
    return jnp.stack(outs[-3:], axis=1).mean(axis=1)


if __name__ == "__main__":
    B, T, C, Hs, Ws = 2, 8, 4, 16, 16           # small shapes
    hidden_dims = [32, 32]
    output_dim = N_CLASS
    input_dim = C * Hs * Ws                     # 1024

    key = jax.random.PRNGKey(0)
    kx, kp, km0, km1 = jax.random.split(key, 4)
    dvs = jax.random.uniform(kx, (B, T, C, Hs, Ws), dtype=jnp.float32)
    params = init_params(kp, input_dim, hidden_dims, output_dim)
    mem_inits = (jax.random.uniform(km0, (B, hidden_dims[0]), dtype=jnp.float32),
                 jax.random.uniform(km1, (B, hidden_dims[1]), dtype=jnp.float32))

    out = neurovpr_dh_snn_forward(dvs, params, mem_inits)
    out = jax.block_until_ready(out)
    assert out.shape == (B, output_dim)

    ref = reference_forward(dvs, params, mem_inits)
    err = float(jnp.max(jnp.abs(out - ref)))
    assert err < 1e-4, f"mismatch vs reference: {err}"
    print("KERNEL_OK")
</pallas_src>

<mosaic_0001>
module attributes {stable_mosaic.version = 11 : i64} {
  func.func @dh_snn_recurrent_kernel(%arg0: i32, %arg1: i32, %arg2: memref<8x8x128xf32, #tpu.memory_space<vmem>>, %arg3: memref<1x128xf32, #tpu.memory_space<vmem>>, %arg4: memref<1x128xf32, #tpu.memory_space<vmem>>, %arg5: memref<1x128xf32, #tpu.memory_space<vmem>>, %arg6: memref<1x128xf32, #tpu.memory_space<vmem>>, %arg7: memref<128x128xf32, #tpu.memory_space<vmem>>, %arg8: memref<8x128xf32, #tpu.memory_space<vmem>>, %arg9: memref<8x128xf32, #tpu.memory_space<vmem>>, %arg10: memref<8x128xf32, #tpu.memory_space<vmem>>, %arg11: memref<8x128xf32, #tpu.memory_space<vmem>>, %arg12: memref<8x128xf32, #tpu.memory_space<vmem>>, %arg13: memref<8x128xf32, #tpu.memory_space<vmem>>, %arg14: memref<8x128xf32, #tpu.memory_space<vmem>>, %arg15: memref<8x128xf32, #tpu.memory_space<vmem>>, %arg16: memref<8x128xf32, #tpu.memory_space<vmem>>) attributes {dimension_semantics = [#tpu.dimension_semantics<parallel>, #tpu.dimension_semantics<arbitrary>], iteration_bounds = array<i64: 1, 1>, scalar_prefetch = 0 : i64, scratch_operands = 6 : i64, tpu.core_type = #tpu.core_type<tc>, window_params = [{transform_indices = @transform_0, window_bounds = array<i64: 8, 8, 128>}, {pipeline_mode = #tpu.pipeline_mode<synchronous>, transform_indices = @transform_1, window_bounds = array<i64: 1, 128>}, {pipeline_mode = #tpu.pipeline_mode<synchronous>, transform_indices = @transform_2, window_bounds = array<i64: 1, 128>}, {pipeline_mode = #tpu.pipeline_mode<synchronous>, transform_indices = @transform_3, window_bounds = array<i64: 1, 128>}, {pipeline_mode = #tpu.pipeline_mode<synchronous>, transform_indices = @transform_4, window_bounds = array<i64: 1, 128>}, {pipeline_mode = #tpu.pipeline_mode<synchronous>, transform_indices = @transform_5, window_bounds = array<i64: 128, 128>}, {transform_indices = @transform_6, window_bounds = array<i64: 8, 128>}, {transform_indices = @transform_7, window_bounds = array<i64: 8, 128>}, {transform_indices = @transform_8, window_bounds = array<i64: 8, 128>}]} {
    %c0_i32 = arith.constant 0 : i32
    %0 = arith.cmpi eq, %arg1, %c0_i32 : i32
    %1 = arith.extui %0 : i1 to i32
    %c0_i32_0 = arith.constant 0 : i32
    %2 = arith.cmpi ne, %1, %c0_i32_0 : i32
    scf.if %2 {
      %cst_178 = arith.constant 0.000000e+00 : f32
      %479 = vector.broadcast %cst_178 : f32 to vector<8x128xf32>
      %c0_179 = arith.constant 0 : index
      %c0_180 = arith.constant 0 : index
      %480 = vector.load %arg11[%c0_179, %c0_180] : memref<8x128xf32, #tpu.memory_space<vmem>>, vector<8x128xf32>
      tpu.vector_store %arg11[%c0_179, %c0_180], %479 {strides = array<i32>} : memref<8x128xf32, #tpu.memory_space<vmem>>, vector<8x128xf32>,
      %c0_181 = arith.constant 0 : index
      %c0_182 = arith.constant 0 : index
      %481 = vector.load %arg8[%c0_181, %c0_182] : memref<8x128xf32, #tpu.memory_space<vmem>>, vector<8x128xf32>
      %c0_183 = arith.constant 0 : index
      %c0_184 = arith.constant 0 : index
      %482 = vector.load %arg12[%c0_183, %c0_184] : memref<8x128xf32, #tpu.memory_space<vmem>>, vector<8x128xf32>
      tpu.vector_store %arg12[%c0_183, %c0_184], %481 {strides = array<i32>} : memref<8x128xf32, #tpu.memory_space<vmem>>, vector<8x128xf32>,
      %cst_185 = arith.constant 0.000000e+00 : f32
      %483 = vector.broadcast %cst_185 : f32 to vector<8x128xf32>
      %c0_186 = arith.constant 0 : index
      %c0_187 = arith.constant 0 : index
      %484 = vector.load %arg13[%c0_186, %c0_187] : memref<8x128xf32, #tpu.memory_space<vmem>>, vector<8x128xf32>
      tpu.vector_store %arg13[%c0_186, %c0_187], %483 {strides = array<i32>} : memref<8x128xf32, #tpu.memory_space<vmem>>, vector<8x128xf32>,
      %cst_188 = arith.constant 0.000000e+00 : f32
      %485 = vector.broadcast %cst_188 : f32 to vector<8x128xf32>
      %c0_189 = arith.constant 0 : index
      %c0_190 = arith.constant 0 : index
      %486 = vector.load %arg14[%c0_189, %c0_190] : memref<8x128xf32, #tpu.memory_space<vmem>>, vector<8x128xf32>
      tpu.vector_store %arg14[%c0_189, %c0_190], %485 {strides = array<i32>} : memref<8x128xf32, #tpu.memory_space<vmem>>, vector<8x128xf32>,
      %c0_191 = arith.constant 0 : index
      %c0_192 = arith.constant 0 : index
      %487 = vector.load %arg9[%c0_191, %c0_192] : memref<8x128xf32, #tpu.memory_space<vmem>>, vector<8x128xf32>
      %c0_193 = arith.constant 0 : index
      %c0_194 = arith.constant 0 : index
      %488 = vector.load %arg15[%c0_193, %c0_194] : memref<8x128xf32, #tpu.memory_space<vmem>>, vector<8x128xf32>
      tpu.vector_store %arg15[%c0_193, %c0_194], %487 {strides = array<i32>} : memref<8x128xf32, #tpu.memory_space<vmem>>, vector<8x128xf32>,
      %cst_195 = arith.constant 0.000000e+00 : f32
      %489 = vector.broadcast %cst_195 : f32 to vector<8x128xf32>
      %c0_196 = arith.constant 0 : index
      %c0_197 = arith.constant 0 : index
      %490 = vector.load %arg16[%c0_196, %c0_197] : memref<8x128xf32, #tpu.memory_space<vmem>>, vector<8x128xf32>
      tpu.vector_store %arg16[%c0_196, %c0_197], %489 {strides = array<i32>} : memref<8x128xf32, #tpu.memory_space<vmem>>, vector<8x128xf32>,
    } else {
    }
    %c0 = arith.constant 0 : index
    %c0_1 = arith.constant 0 : index
    %3 = vector.load %arg3[%c0, %c0_1] : memref<1x128xf32, #tpu.memory_space<vmem>>, vector<1x128xf32>
    %cst = arith.constant 1.000000e+00 : f32
    %4 = vector.broadcast %cst : f32 to vector<1x128xf32>
    %5 = arith.subf %4, %3 : vector<1x128xf32>
    %c0_2 = arith.constant 0 : index
    %c0_3 = arith.constant 0 : index
    %6 = vector.load %arg4[%c0_2, %c0_3] : memref<1x128xf32, #tpu.memory_space<vmem>>, vector<1x128xf32>
    %cst_4 = arith.constant 1.000000e+00 : f32
    %7 = vector.broadcast %cst_4 : f32 to vector<1x128xf32>
    %8 = arith.subf %7, %6 : vector<1x128xf32>
    %c0_5 = arith.constant 0 : index
    %c0_6 = arith.constant 0 : index
    %9 = vector.load %arg5[%c0_5, %c0_6] : memref<1x128xf32, #tpu.memory_space<vmem>>, vector<1x128xf32>
    %cst_7 = arith.constant 1.000000e+00 : f32
    %10 = vector.broadcast %cst_7 : f32 to vector<1x128xf32>
    %11 = arith.subf %10, %9 : vector<1x128xf32>
    %c0_8 = arith.constant 0 : index
    %c0_9 = arith.constant 0 : index
    %12 = vector.load %arg6[%c0_8, %c0_9] : memref<1x128xf32, #tpu.memory_space<vmem>>, vector<1x128xf32>
    %cst_10 = arith.constant 1.000000e+00 : f32
    %13 = vector.broadcast %cst_10 : f32 to vector<1x128xf32>
    %14 = arith.subf %13, %12 : vector<1x128xf32>
    %c0_11 = arith.constant 0 : index
    %c0_12 = arith.constant 0 : index
    %15 = vector.load %arg7[%c0_11, %c0_12] : memref<128x128xf32, #tpu.memory_space<vmem>>, vector<128x128xf32>
    %c8_i32 = arith.constant 8 : i32
    %16 = arith.muli %arg1, %c8_i32 : i32
    %c0_13 = arith.constant 0 : index
    %c0_14 = arith.constant 0 : index
    %17 = vector.load %arg11[%c0_13, %c0_14] : memref<8x128xf32, #tpu.memory_space<vmem>>, vector<8x128xf32>
    %c0_15 = arith.constant 0 : index
    %c0_16 = arith.constant 0 : index
    %18 = vector.load %arg12[%c0_15, %c0_16] : memref<8x128xf32, #tpu.memory_space<vmem>>, vector<8x128xf32>
    %c0_17 = arith.constant 0 : index
    %c0_18 = arith.constant 0 : index
    %19 = vector.load %arg13[%c0_17, %c0_18] : memref<8x128xf32, #tpu.memory_space<vmem>>, vector<8x128xf32>
    %c0_19 = arith.constant 0 : index
    %c0_20 = arith.constant 0 : index
    %20 = vector.load %arg14[%c0_19, %c0_20] : memref<8x128xf32, #tpu.memory_space<vmem>>, vector<8x128xf32>
    %c0_21 = arith.constant 0 : index
    %c0_22 = arith.constant 0 : index
    %21 = vector.load %arg15[%c0_21, %c0_22] : memref<8x128xf32, #tpu.memory_space<vmem>>, vector<8x128xf32>
    %c0_23 = arith.constant 0 : index
    %c0_24 = arith.constant 0 : index
    %22 = vector.load %arg16[%c0_23, %c0_24] : memref<8x128xf32, #tpu.memory_space<vmem>>, vector<8x128xf32>
    %cst_25 = arith.constant 0.000000e+00 : f32
    %23 = vector.broadcast %cst_25 : f32 to vector<8x128xf32>
    %c0_i32_26 = arith.constant 0 : i32
    %24 = arith.index_cast %c0_i32_26 : i32 to index
    %c0_27 = arith.constant 0 : index
    %c0_28 = arith.constant 0 : index
    %25 = vector.load %arg2[%24, %c0_27, %c0_28] : memref<8x8x128xf32, #tpu.memory_space<vmem>>, vector<1x8x128xf32>
    %26 = vector.shape_cast %25 : vector<1x8x128xf32> to vector<8x128xf32>
    %27 = vector.broadcast %3 : vector<1x128xf32> to vector<8x128xf32>
    %28 = arith.mulf %27, %17 : vector<8x128xf32>
    %29 = vector.broadcast %5 : vector<1x128xf32> to vector<8x128xf32>
    %30 = arith.mulf %29, %26 : vector<8x128xf32>
    %31 = arith.addf %28, %30 : vector<8x128xf32>
    %32 = vector.broadcast %6 : vector<1x128xf32> to vector<8x128xf32>
    %33 = arith.mulf %32, %18 : vector<8x128xf32>
    %34 = vector.broadcast %8 : vector<1x128xf32> to vector<8x128xf32>
    %35 = arith.mulf %34, %31 : vector<8x128xf32>
    %36 = arith.addf %33, %35 : vector<8x128xf32>
    %37 = arith.subf %36, %19 : vector<8x128xf32>
    %cst_29 = arith.constant 1.000000e+00 : f32
    %38 = vector.broadcast %cst_29 : f32 to vector<8x128xf32>
    %39 = arith.subf %37, %38 : vector<8x128xf32>
    %cst_30 = arith.constant 0.000000e+00 : f32
    %40 = vector.broadcast %cst_30 : f32 to vector<8x128xf32>
    %41 = arith.cmpf ogt, %39, %40 : vector<8x128xf32>
    %cst_31 = arith.constant 2.000000e+00 : f32
    %42 = vector.broadcast %cst_31 : f32 to vector<8x128xf32>
    %43 = arith.mulf %42, %39 : vector<8x128xf32>
    %44 = math.tanh %43 : vector<8x128xf32>
    %cst_32 = arith.constant 5.000000e-01 : f32
    %45 = vector.broadcast %cst_32 : f32 to vector<8x128xf32>
    %46 = arith.mulf %45, %44 : vector<8x128xf32>
    %cst_33 = arith.constant 1.000000e+00 : f32
    %47 = vector.broadcast %cst_33 : f32 to vector<8x128xf32>
    %48 = arith.select %41, %47, %46 : vector<8x128xi1>, vector<8x128xf32>
    %cst_34 = arith.constant dense<0.000000e+00> : vector<8x128xf32>
    %49 = tpu.matmul %48, %15, %cst_34 {dimension_numbers = #tpu.dot_dimension_numbers<[1], [0], [0], [1], [0, 0, 1, 1], [], []>} : vector<8x128xf32>, vector<128x128xf32>, vector<8x128xf32> -> vector<8x128xf32>
    %50 = vector.broadcast %9 : vector<1x128xf32> to vector<8x128xf32>
    %51 = arith.mulf %50, %20 : vector<8x128xf32>
    %52 = vector.broadcast %11 : vector<1x128xf32> to vector<8x128xf32>
    %53 = arith.mulf %52, %49 : vector<8x128xf32>
    %54 = arith.addf %51, %53 : vector<8x128xf32>
    %55 = vector.broadcast %12 : vector<1x128xf32> to vector<8x128xf32>
    %56 = arith.mulf %55, %21 : vector<8x128xf32>
    %57 = vector.broadcast %14 : vector<1x128xf32> to vector<8x128xf32>
    %58 = arith.mulf %57, %54 : vector<8x128xf32>
    %59 = arith.addf %56, %58 : vector<8x128xf32>
    %60 = arith.subf %59, %22 : vector<8x128xf32>
    %cst_35 = arith.constant 1.000000e+00 : f32
    %61 = vector.broadcast %cst_35 : f32 to vector<8x128xf32>
    %62 = arith.subf %60, %61 : vector<8x128xf32>
    %cst_36 = arith.constant 0.000000e+00 : f32
    %63 = vector.broadcast %cst_36 : f32 to vector<8x128xf32>
    %64 = arith.cmpf ogt, %62, %63 : vector<8x128xf32>
    %cst_37 = arith.constant 2.000000e+00 : f32
    %65 = vector.broadcast %cst_37 : f32 to vector<8x128xf32>
    %66 = arith.mulf %65, %62 : vector<8x128xf32>
    %67 = math.tanh %66 : vector<8x128xf32>
    %cst_38 = arith.constant 5.000000e-01 : f32
    %68 = vector.broadcast %cst_38 : f32 to vector<8x128xf32>
    %69 = arith.mulf %68, %67 : vector<8x128xf32>
    %cst_39 = arith.constant 1.000000e+00 : f32
    %70 = vector.broadcast %cst_39 : f32 to vector<8x128xf32>
    %71 = arith.select %64, %70, %69 : vector<8x128xi1>, vector<8x128xf32>
    %72 = arith.addi %16, %c0_i32_26 : i32
    %c5_i32 = arith.constant 5 : i32
    %73 = arith.cmpi sge, %72, %c5_i32 : i32
    %c8_i32_40 = arith.constant 8 : i32
    %74 = arith.cmpi slt, %72, %c8_i32_40 : i32
    %75 = arith.andi %73, %74 : i1
    %cst_41 = arith.constant 0.333333343 : f32
    %cst_42 = arith.constant 0.000000e+00 : f32
    %76 = arith.select %75, %cst_41, %cst_42 : f32
    %77 = vector.broadcast %76 : f32 to vector<8x128xf32>
    %78 = arith.mulf %77, %71 : vector<8x128xf32>
    %79 = arith.addf %23, %78 : vector<8x128xf32>
    %c1_i32 = arith.constant 1 : i32
    %80 = arith.index_cast %c1_i32 : i32 to index
    %c0_43 = arith.constant 0 : index
    %c0_44 = arith.constant 0 : index
    %81 = vector.load %arg2[%80, %c0_43, %c0_44] : memref<8x8x128xf32, #tpu.memory_space<vmem>>, vector<1x8x128xf32>
    %82 = vector.shape_cast %81 : vector<1x8x128xf32> to vector<8x128xf32>
    %83 = vector.broadcast %3 : vector<1x128xf32> to vector<8x128xf32>
    %84 = arith.mulf %83, %31 : vector<8x128xf32>
    %85 = vector.broadcast %5 : vector<1x128xf32> to vector<8x128xf32>
    %86 = arith.mulf %85, %82 : vector<8x128xf32>
    %87 = arith.addf %84, %86 : vector<8x128xf32>
    %88 = vector.broadcast %6 : vector<1x128xf32> to vector<8x128xf32>
    %89 = arith.mulf %88, %37 : vector<8x128xf32>
    %90 = vector.broadcast %8 : vector<1x128xf32> to vector<8x128xf32>
    %91 = arith.mulf %90, %87 : vector<8x128xf32>
    %92 = arith.addf %89, %91 : vector<8x128xf32>
    %93 = arith.subf %92, %48 : vector<8x128xf32>
    %cst_45 = arith.constant 1.000000e+00 : f32
    %94 = vector.broadcast %cst_45 : f32 to vector<8x128xf32>
    %95 = arith.subf %93, %94 : vector<8x128xf32>
    %cst_46 = arith.constant 0.000000e+00 : f32
    %96 = vector.broadcast %cst_46 : f32 to vector<8x128xf32>
    %97 = arith.cmpf ogt, %95, %96 : vector<8x128xf32>
    %cst_47 = arith.constant 2.000000e+00 : f32
    %98 = vector.broadcast %cst_47 : f32 to vector<8x128xf32>
    %99 = arith.mulf %98, %95 : vector<8x128xf32>
    %100 = math.tanh %99 : vector<8x128xf32>
    %cst_48 = arith.constant 5.000000e-01 : f32
    %101 = vector.broadcast %cst_48 : f32 to vector<8x128xf32>
    %102 = arith.mulf %101, %100 : vector<8x128xf32>
    %cst_49 = arith.constant 1.000000e+00 : f32
    %103 = vector.broadcast %cst_49 : f32 to vector<8x128xf32>
    %104 = arith.select %97, %103, %102 : vector<8x128xi1>, vector<8x128xf32>
    %cst_50 = arith.constant dense<0.000000e+00> : vector<8x128xf32>
    %105 = tpu.matmul %104, %15, %cst_50 {dimension_numbers = #tpu.dot_dimension_numbers<[1], [0], [0], [1], [0, 0, 1, 1], [], []>} : vector<8x128xf32>, vector<128x128xf32>, vector<8x128xf32> -> vector<8x128xf32>
    %106 = vector.broadcast %9 : vector<1x128xf32> to vector<8x128xf32>
    %107 = arith.mulf %106, %54 : vector<8x128xf32>
    %108 = vector.broadcast %11 : vector<1x128xf32> to vector<8x128xf32>
    %109 = arith.mulf %108, %105 : vector<8x128xf32>
    %110 = arith.addf %107, %109 : vector<8x128xf32>
    %111 = vector.broadcast %12 : vector<1x128xf32> to vector<8x128xf32>
    %112 = arith.mulf %111, %60 : vector<8x128xf32>
    %113 = vector.broadcast %14 : vector<1x128xf32> to vector<8x128xf32>
    %114 = arith.mulf %113, %110 : vector<8x128xf32>
    %115 = arith.addf %112, %114 : vector<8x128xf32>
    %116 = arith.subf %115, %71 : vector<8x128xf32>
    %cst_51 = arith.constant 1.000000e+00 : f32
    %117 = vector.broadcast %cst_51 : f32 to vector<8x128xf32>
    %118 = arith.subf %116, %117 : vector<8x128xf32>
    %cst_52 = arith.constant 0.000000e+00 : f32
    %119 = vector.broadcast %cst_52 : f32 to vector<8x128xf32>
    %120 = arith.cmpf ogt, %118, %119 : vector<8x128xf32>
    %cst_53 = arith.constant 2.000000e+00 : f32
    %121 = vector.broadcast %cst_53 : f32 to vector<8x128xf32>
    %122 = arith.mulf %121, %118 : vector<8x128xf32>
    %123 = math.tanh %122 : vector<8x128xf32>
    %cst_54 = arith.constant 5.000000e-01 : f32
    %124 = vector.broadcast %cst_54 : f32 to vector<8x128xf32>
    %125 = arith.mulf %124, %123 : vector<8x128xf32>
    %cst_55 = arith.constant 1.000000e+00 : f32
    %126 = vector.broadcast %cst_55 : f32 to vector<8x128xf32>
    %127 = arith.select %120, %126, %125 : vector<8x128xi1>, vector<8x128xf32>
    %128 = arith.addi %16, %c1_i32 : i32
    %c5_i32_56 = arith.constant 5 : i32
    %129 = arith.cmpi sge, %128, %c5_i32_56 : i32
    %c8_i32_57 = arith.constant 8 : i32
    %130 = arith.cmpi slt, %128, %c8_i32_57 : i32
    %131 = arith.andi %129, %130 : i1
    %cst_58 = arith.constant 0.333333343 : f32
    %cst_59 = arith.constant 0.000000e+00 : f32
    %132 = arith.select %131, %cst_58, %cst_59 : f32
    %133 = vector.broadcast %132 : f32 to vector<8x128xf32>
    %134 = arith.mulf %133, %127 : vector<8x128xf32>
    %135 = arith.addf %79, %134 : vector<8x128xf32>
    %c2_i32 = arith.constant 2 : i32
    %136 = arith.index_cast %c2_i32 : i32 to index
    %c0_60 = arith.constant 0 : index
    %c0_61 = arith.constant 0 : index
    %137 = vector.load %arg2[%136, %c0_60, %c0_61] : memref<8x8x128xf32, #tpu.memory_space<vmem>>, vector<1x8x128xf32>
    %138 = vector.shape_cast %137 : vector<1x8x128xf32> to vector<8x128xf32>
    %139 = vector.broadcast %3 : vector<1x128xf32> to vector<8x128xf32>
    %140 = arith.mulf %139, %87 : vector<8x128xf32>
    %141 = vector.broadcast %5 : vector<1x128xf32> to vector<8x128xf32>
    %142 = arith.mulf %141, %138 : vector<8x128xf32>
    %143 = arith.addf %140, %142 : vector<8x128xf32>
    %144 = vector.broadcast %6 : vector<1x128xf32> to vector<8x128xf32>
    %145 = arith.mulf %144, %93 : vector<8x128xf32>
    %146 = vector.broadcast %8 : vector<1x128xf32> to vector<8x128xf32>
    %147 = arith.mulf %146, %143 : vector<8x128xf32>
    %148 = arith.addf %145, %147 : vector<8x128xf32>
    %149 = arith.subf %148, %104 : vector<8x128xf32>
    %cst_62 = arith.constant 1.000000e+00 : f32
    %150 = vector.broadcast %cst_62 : f32 to vector<8x128xf32>
    %151 = arith.subf %149, %150 : vector<8x128xf32>
    %cst_63 = arith.constant 0.000000e+00 : f32
    %152 = vector.broadcast %cst_63 : f32 to vector<8x128xf32>
    %153 = arith.cmpf ogt, %151, %152 : vector<8x128xf32>
    %cst_64 = arith.constant 2.000000e+00 : f32
    %154 = vector.broadcast %cst_64 : f32 to vector<8x128xf32>
    %155 = arith.mulf %154, %151 : vector<8x128xf32>
    %156 = math.tanh %155 : vector<8x128xf32>
    %cst_65 = arith.constant 5.000000e-01 : f32
    %157 = vector.broadcast %cst_65 : f32 to vector<8x128xf32>
    %158 = arith.mulf %157, %156 : vector<8x128xf32>
    %cst_66 = arith.constant 1.000000e+00 : f32
    %159 = vector.broadcast %cst_66 : f32 to vector<8x128xf32>
    %160 = arith.select %153, %159, %158 : vector<8x128xi1>, vector<8x128xf32>
    %cst_67 = arith.constant dense<0.000000e+00> : vector<8x128xf32>
    %161 = tpu.matmul %160, %15, %cst_67 {dimension_numbers = #tpu.dot_dimension_numbers<[1], [0], [0], [1], [0, 0, 1, 1], [], []>} : vector<8x128xf32>, vector<128x128xf32>, vector<8x128xf32> -> vector<8x128xf32>
    %162 = vector.broadcast %9 : vector<1x128xf32> to vector<8x128xf32>
    %163 = arith.mulf %162, %110 : vector<8x128xf32>
    %164 = vector.broadcast %11 : vector<1x128xf32> to vector<8x128xf32>
    %165 = arith.mulf %164, %161 : vector<8x128xf32>
    %166 = arith.addf %163, %165 : vector<8x128xf32>
    %167 = vector.broadcast %12 : vector<1x128xf32> to vector<8x128xf32>
    %168 = arith.mulf %167, %116 : vector<8x128xf32>
    %169 = vector.broadcast %14 : vector<1x128xf32> to vector<8x128xf32>
    %170 = arith.mulf %169, %166 : vector<8x128xf32>
    %171 = arith.addf %168, %170 : vector<8x128xf32>
    %172 = arith.subf %171, %127 : vector<8x128xf32>
    %cst_68 = arith.constant 1.000000e+00 : f32
    %173 = vector.broadcast %cst_68 : f32 to vector<8x128xf32>
    %174 = arith.subf %172, %173 : vector<8x128xf32>
    %cst_69 = arith.constant 0.000000e+00 : f32
    %175 = vector.broadcast %cst_69 : f32 to vector<8x128xf32>
    %176 = arith.cmpf ogt, %174, %175 : vector<8x128xf32>
    %cst_70 = arith.constant 2.000000e+00 : f32
    %177 = vector.broadcast %cst_70 : f32 to vector<8x128xf32>
    %178 = arith.mulf %177, %174 : vector<8x128xf32>
    %179 = math.tanh %178 : vector<8x128xf32>
    %cst_71 = arith.constant 5.000000e-01 : f32
    %180 = vector.broadcast %cst_71 : f32 to vector<8x128xf32>
    %181 = arith.mulf %180, %179 : vector<8x128xf32>
    %cst_72 = arith.constant 1.000000e+00 : f32
    %182 = vector.broadcast %cst_72 : f32 to vector<8x128xf32>
    %183 = arith.select %176, %182, %181 : vector<8x128xi1>, vector<8x128xf32>
    %184 = arith.addi %16, %c2_i32 : i32
    %c5_i32_73 = arith.constant 5 : i32
    %185 = arith.cmpi sge, %184, %c5_i32_73 : i32
    %c8_i32_74 = arith.constant 8 : i32
    %186 = arith.cmpi slt, %184, %c8_i32_74 : i32
    %187 = arith.andi %185, %186 : i1
    %cst_75 = arith.constant 0.333333343 : f32
    %cst_76 = arith.constant 0.000000e+00 : f32
    %188 = arith.select %187, %cst_75, %cst_76 : f32
    %189 = vector.broadcast %188 : f32 to vector<8x128xf32>
    %190 = arith.mulf %189, %183 : vector<8x128xf32>
    %191 = arith.addf %135, %190 : vector<8x128xf32>
    %c3_i32 = arith.constant 3 : i32
    %192 = arith.index_cast %c3_i32 : i32 to index
    %c0_77 = arith.constant 0 : index
    %c0_78 = arith.constant 0 : index
    %193 = vector.load %arg2[%192, %c0_77, %c0_78] : memref<8x8x128xf32, #tpu.memory_space<vmem>>, vector<1x8x128xf32>
    %194 = vector.shape_cast %193 : vector<1x8x128xf32> to vector<8x128xf32>
    %195 = vector.broadcast %3 : vector<1x128xf32> to vector<8x128xf32>
    %196 = arith.mulf %195, %143 : vector<8x128xf32>
    %197 = vector.broadcast %5 : vector<1x128xf32> to vector<8x128xf32>
    %198 = arith.mulf %197, %194 : vector<8x128xf32>
    %199 = arith.addf %196, %198 : vector<8x128xf32>
    %200 = vector.broadcast %6 : vector<1x128xf32> to vector<8x128xf32>
    %201 = arith.mulf %200, %149 : vector<8x128xf32>
    %202 = vector.broadcast %8 : vector<1x128xf32> to vector<8x128xf32>
    %203 = arith.mulf %202, %199 : vector<8x128xf32>
    %204 = arith.addf %201, %203 : vector<8x128xf32>
    %205 = arith.subf %204, %160 : vector<8x128xf32>
    %cst_79 = arith.constant 1.000000e+00 : f32
    %206 = vector.broadcast %cst_79 : f32 to vector<8x128xf32>
    %207 = arith.subf %205, %206 : vector<8x128xf32>
    %cst_80 = arith.constant 0.000000e+00 : f32
    %208 = vector.broadcast %cst_80 : f32 to vector<8x128xf32>
    %209 = arith.cmpf ogt, %207, %208 : vector<8x128xf32>
    %cst_81 = arith.constant 2.000000e+00 : f32
    %210 = vector.broadcast %cst_81 : f32 to vector<8x128xf32>
    %211 = arith.mulf %210, %207 : vector<8x128xf32>
    %212 = math.tanh %211 : vector<8x128xf32>
    %cst_82 = arith.constant 5.000000e-01 : f32
    %213 = vector.broadcast %cst_82 : f32 to vector<8x128xf32>
    %214 = arith.mulf %213, %212 : vector<8x128xf32>
    %cst_83 = arith.constant 1.000000e+00 : f32
    %215 = vector.broadcast %cst_83 : f32 to vector<8x128xf32>
    %216 = arith.select %209, %215, %214 : vector<8x128xi1>, vector<8x128xf32>
    %cst_84 = arith.constant dense<0.000000e+00> : vector<8x128xf32>
    %217 = tpu.matmul %216, %15, %cst_84 {dimension_numbers = #tpu.dot_dimension_numbers<[1], [0], [0], [1], [0, 0, 1, 1], [], []>} : vector<8x128xf32>, vector<128x128xf32>, vector<8x128xf32> -> vector<8x128xf32>
    %218 = vector.broadcast %9 : vector<1x128xf32> to vector<8x128xf32>
    %219 = arith.mulf %218, %166 : vector<8x128xf32>
    %220 = vector.broadcast %11 : vector<1x128xf32> to vector<8x128xf32>
    %221 = arith.mulf %220, %217 : vector<8x128xf32>
    %222 = arith.addf %219, %221 : vector<8x128xf32>
    %223 = vector.broadcast %12 : vector<1x128xf32> to vector<8x128xf32>
    %224 = arith.mulf %223, %172 : vector<8x128xf32>
    %225 = vector.broadcast %14 : vector<1x128xf32> to vector<8x128xf32>
    %226 = arith.mulf %225, %222 : vector<8x128xf32>
    %227 = arith.addf %224, %226 : vector<8x128xf32>
    %228 = arith.subf %227, %183 : vector<8x128xf32>
    %cst_85 = arith.constant 1.000000e+00 : f32
    %229 = vector.broadcast %cst_85 : f32 to vector<8x128xf32>
    %230 = arith.subf %228, %229 : vector<8x128xf32>
    %cst_86 = arith.constant 0.000000e+00 : f32
    %231 = vector.broadcast %cst_86 : f32 to vector<8x128xf32>
    %232 = arith.cmpf ogt, %230, %231 : vector<8x128xf32>
    %cst_87 = arith.constant 2.000000e+00 : f32
    %233 = vector.broadcast %cst_87 : f32 to vector<8x128xf32>
    %234 = arith.mulf %233, %230 : vector<8x128xf32>
    %235 = math.tanh %234 : vector<8x128xf32>
    %cst_88 = arith.constant 5.000000e-01 : f32
    %236 = vector.broadcast %cst_88 : f32 to vector<8x128xf32>
    %237 = arith.mulf %236, %235 : vector<8x128xf32>
    %cst_89 = arith.constant 1.000000e+00 : f32
    %238 = vector.broadcast %cst_89 : f32 to vector<8x128xf32>
    %239 = arith.select %232, %238, %237 : vector<8x128xi1>, vector<8x128xf32>
    %240 = arith.addi %16, %c3_i32 : i32
    %c5_i32_90 = arith.constant 5 : i32
    %241 = arith.cmpi sge, %240, %c5_i32_90 : i32
    %c8_i32_91 = arith.constant 8 : i32
    %242 = arith.cmpi slt, %240, %c8_i32_91 : i32
    %243 = arith.andi %241, %242 : i1
    %cst_92 = arith.constant 0.333333343 : f32
    %cst_93 = arith.constant 0.000000e+00 : f32
    %244 = arith.select %243, %cst_92, %cst_93 : f32
    %245 = vector.broadcast %244 : f32 to vector<8x128xf32>
    %246 = arith.mulf %245, %239 : vector<8x128xf32>
    %247 = arith.addf %191, %246 : vector<8x128xf32>
    %c4_i32 = arith.constant 4 : i32
    %248 = arith.index_cast %c4_i32 : i32 to index
    %c0_94 = arith.constant 0 : index
    %c0_95 = arith.constant 0 : index
    %249 = vector.load %arg2[%248, %c0_94, %c0_95] : memref<8x8x128xf32, #tpu.memory_space<vmem>>, vector<1x8x128xf32>
    %250 = vector.shape_cast %249 : vector<1x8x128xf32> to vector<8x128xf32>
    %251 = vector.broadcast %3 : vector<1x128xf32> to vector<8x128xf32>
    %252 = arith.mulf %251, %199 : vector<8x128xf32>
    %253 = vector.broadcast %5 : vector<1x128xf32> to vector<8x128xf32>
    %254 = arith.mulf %253, %250 : vector<8x128xf32>
    %255 = arith.addf %252, %254 : vector<8x128xf32>
    %256 = vector.broadcast %6 : vector<1x128xf32> to vector<8x128xf32>
    %257 = arith.mulf %256, %205 : vector<8x128xf32>
    %258 = vector.broadcast %8 : vector<1x128xf32> to vector<8x128xf32>
    %259 = arith.mulf %258, %255 : vector<8x128xf32>
    %260 = arith.addf %257, %259 : vector<8x128xf32>
    %261 = arith.subf %260, %216 : vector<8x128xf32>
    %cst_96 = arith.constant 1.000000e+00 : f32
    %262 = vector.broadcast %cst_96 : f32 to vector<8x128xf32>
    %263 = arith.subf %261, %262 : vector<8x128xf32>
    %cst_97 = arith.constant 0.000000e+00 : f32
    %264 = vector.broadcast %cst_97 : f32 to vector<8x128xf32>
    %265 = arith.cmpf ogt, %263, %264 : vector<8x128xf32>
    %cst_98 = arith.constant 2.000000e+00 : f32
    %266 = vector.broadcast %cst_98 : f32 to vector<8x128xf32>
    %267 = arith.mulf %266, %263 : vector<8x128xf32>
    %268 = math.tanh %267 : vector<8x128xf32>
    %cst_99 = arith.constant 5.000000e-01 : f32
    %269 = vector.broadcast %cst_99 : f32 to vector<8x128xf32>
    %270 = arith.mulf %269, %268 : vector<8x128xf32>
    %cst_100 = arith.constant 1.000000e+00 : f32
    %271 = vector.broadcast %cst_100 : f32 to vector<8x128xf32>
    %272 = arith.select %265, %271, %270 : vector<8x128xi1>, vector<8x128xf32>
    %cst_101 = arith.constant dense<0.000000e+00> : vector<8x128xf32>
    %273 = tpu.matmul %272, %15, %cst_101 {dimension_numbers = #tpu.dot_dimension_numbers<[1], [0], [0], [1], [0, 0, 1, 1], [], []>} : vector<8x128xf32>, vector<128x128xf32>, vector<8x128xf32> -> vector<8x128xf32>
    %274 = vector.broadcast %9 : vector<1x128xf32> to vector<8x128xf32>
    %275 = arith.mulf %274, %222 : vector<8x128xf32>
    %276 = vector.broadcast %11 : vector<1x128xf32> to vector<8x128xf32>
    %277 = arith.mulf %276, %273 : vector<8x128xf32>
    %278 = arith.addf %275, %277 : vector<8x128xf32>
    %279 = vector.broadcast %12 : vector<1x128xf32> to vector<8x128xf32>
    %280 = arith.mulf %279, %228 : vector<8x128xf32>
    %281 = vector.broadcast %14 : vector<1x128xf32> to vector<8x128xf32>
    %282 = arith.mulf %281, %278 : vector<8x128xf32>
    %283 = arith.addf %280, %282 : vector<8x128xf32>
    %284 = arith.subf %283, %239 : vector<8x128xf32>
    %cst_102 = arith.constant 1.000000e+00 : f32
    %285 = vector.broadcast %cst_102 : f32 to vector<8x128xf32>
    %286 = arith.subf %284, %285 : vector<8x128xf32>
    %cst_103 = arith.constant 0.000000e+00 : f32
    %287 = vector.broadcast %cst_103 : f32 to vector<8x128xf32>
    %288 = arith.cmpf ogt, %286, %287 : vector<8x128xf32>
    %cst_104 = arith.constant 2.000000e+00 : f32
    %289 = vector.broadcast %cst_104 : f32 to vector<8x128xf32>
    %290 = arith.mulf %289, %286 : vector<8x128xf32>
    %291 = math.tanh %290 : vector<8x128xf32>
    %cst_105 = arith.constant 5.000000e-01 : f32
    %292 = vector.broadcast %cst_105 : f32 to vector<8x128xf32>
    %293 = arith.mulf %292, %291 : vector<8x128xf32>
    %cst_106 = arith.constant 1.000000e+00 : f32
    %294 = vector.broadcast %cst_106 : f32 to vector<8x128xf32>
    %295 = arith.select %288, %294, %293 : vector<8x128xi1>, vector<8x128xf32>
    %296 = arith.addi %16, %c4_i32 : i32
    %c5_i32_107 = arith.constant 5 : i32
    %297 = arith.cmpi sge, %296, %c5_i32_107 : i32
    %c8_i32_108 = arith.constant 8 : i32
    %298 = arith.cmpi slt, %296, %c8_i32_108 : i32
    %299 = arith.andi %297, %298 : i1
    %cst_109 = arith.constant 0.333333343 : f32
    %cst_110 = arith.constant 0.000000e+00 : f32
    %300 = arith.select %299, %cst_109, %cst_110 : f32
    %301 = vector.broadcast %300 : f32 to vector<8x128xf32>
    %302 = arith.mulf %301, %295 : vector<8x128xf32>
    %303 = arith.addf %247, %302 : vector<8x128xf32>
    %c5_i32_111 = arith.constant 5 : i32
    %304 = arith.index_cast %c5_i32_111 : i32 to index
    %c0_112 = arith.constant 0 : index
    %c0_113 = arith.constant 0 : index
    %305 = vector.load %arg2[%304, %c0_112, %c0_113] : memref<8x8x128xf32, #tpu.memory_space<vmem>>, vector<1x8x128xf32>
    %306 = vector.shape_cast %305 : vector<1x8x128xf32> to vector<8x128xf32>
    %307 = vector.broadcast %3 : vector<1x128xf32> to vector<8x128xf32>
    %308 = arith.mulf %307, %255 : vector<8x128xf32>
    %309 = vector.broadcast %5 : vector<1x128xf32> to vector<8x128xf32>
    %310 = arith.mulf %309, %306 : vector<8x128xf32>
    %311 = arith.addf %308, %310 : vector<8x128xf32>
    %312 = vector.broadcast %6 : vector<1x128xf32> to vector<8x128xf32>
    %313 = arith.mulf %312, %261 : vector<8x128xf32>
    %314 = vector.broadcast %8 : vector<1x128xf32> to vector<8x128xf32>
    %315 = arith.mulf %314, %311 : vector<8x128xf32>
    %316 = arith.addf %313, %315 : vector<8x128xf32>
    %317 = arith.subf %316, %272 : vector<8x128xf32>
    %cst_114 = arith.constant 1.000000e+00 : f32
    %318 = vector.broadcast %cst_114 : f32 to vector<8x128xf32>
    %319 = arith.subf %317, %318 : vector<8x128xf32>
    %cst_115 = arith.constant 0.000000e+00 : f32
    %320 = vector.broadcast %cst_115 : f32 to vector<8x128xf32>
    %321 = arith.cmpf ogt, %319, %320 : vector<8x128xf32>
    %cst_116 = arith.constant 2.000000e+00 : f32
    %322 = vector.broadcast %cst_116 : f32 to vector<8x128xf32>
    %323 = arith.mulf %322, %319 : vector<8x128xf32>
    %324 = math.tanh %323 : vector<8x128xf32>
    %cst_117 = arith.constant 5.000000e-01 : f32
    %325 = vector.broadcast %cst_117 : f32 to vector<8x128xf32>
    %326 = arith.mulf %325, %324 : vector<8x128xf32>
    %cst_118 = arith.constant 1.000000e+00 : f32
    %327 = vector.broadcast %cst_118 : f32 to vector<8x128xf32>
    %328 = arith.select %321, %327, %326 : vector<8x128xi1>, vector<8x128xf32>
    %cst_119 = arith.constant dense<0.000000e+00> : vector<8x128xf32>
    %329 = tpu.matmul %328, %15, %cst_119 {dimension_numbers = #tpu.dot_dimension_numbers<[1], [0], [0], [1], [0, 0, 1, 1], [], []>} : vector<8x128xf32>, vector<128x128xf32>, vector<8x128xf32> -> vector<8x128xf32>
    %330 = vector.broadcast %9 : vector<1x128xf32> to vector<8x128xf32>
    %331 = arith.mulf %330, %278 : vector<8x128xf32>
    %332 = vector.broadcast %11 : vector<1x128xf32> to vector<8x128xf32>
    %333 = arith.mulf %332, %329 : vector<8x128xf32>
    %334 = arith.addf %331, %333 : vector<8x128xf32>
    %335 = vector.broadcast %12 : vector<1x128xf32> to vector<8x128xf32>
    %336 = arith.mulf %335, %284 : vector<8x128xf32>
    %337 = vector.broadcast %14 : vector<1x128xf32> to vector<8x128xf32>
    %338 = arith.mulf %337, %334 : vector<8x128xf32>
    %339 = arith.addf %336, %338 : vector<8x128xf32>
    %340 = arith.subf %339, %295 : vector<8x128xf32>
    %cst_120 = arith.constant 1.000000e+00 : f32
    %341 = vector.broadcast %cst_120 : f32 to vector<8x128xf32>
    %342 = arith.subf %340, %341 : vector<8x128xf32>
    %cst_121 = arith.constant 0.000000e+00 : f32
    %343 = vector.broadcast %cst_121 : f32 to vector<8x128xf32>
    %344 = arith.cmpf ogt, %342, %343 : vector<8x128xf32>
    %cst_122 = arith.constant 2.000000e+00 : f32
    %345 = vector.broadcast %cst_122 : f32 to vector<8x128xf32>
    %346 = arith.mulf %345, %342 : vector<8x128xf32>
    %347 = math.tanh %346 : vector<8x128xf32>
    %cst_123 = arith.constant 5.000000e-01 : f32
    %348 = vector.broadcast %cst_123 : f32 to vector<8x128xf32>
    %349 = arith.mulf %348, %347 : vector<8x128xf32>
    %cst_124 = arith.constant 1.000000e+00 : f32
    %350 = vector.broadcast %cst_124 : f32 to vector<8x128xf32>
    %351 = arith.select %344, %350, %349 : vector<8x128xi1>, vector<8x128xf32>
    %352 = arith.addi %16, %c5_i32_111 : i32
    %c5_i32_125 = arith.constant 5 : i32
    %353 = arith.cmpi sge, %352, %c5_i32_125 : i32
    %c8_i32_126 = arith.constant 8 : i32
    %354 = arith.cmpi slt, %352, %c8_i32_126 : i32
    %355 = arith.andi %353, %354 : i1
    %cst_127 = arith.constant 0.333333343 : f32
    %cst_128 = arith.constant 0.000000e+00 : f32
    %356 = arith.select %355, %cst_127, %cst_128 : f32
    %357 = vector.broadcast %356 : f32 to vector<8x128xf32>
    %358 = arith.mulf %357, %351 : vector<8x128xf32>
    %359 = arith.addf %303, %358 : vector<8x128xf32>
    %c6_i32 = arith.constant 6 : i32
    %360 = arith.index_cast %c6_i32 : i32 to index
    %c0_129 = arith.constant 0 : index
    %c0_130 = arith.constant 0 : index
    %361 = vector.load %arg2[%360, %c0_129, %c0_130] : memref<8x8x128xf32, #tpu.memory_space<vmem>>, vector<1x8x128xf32>
    %362 = vector.shape_cast %361 : vector<1x8x128xf32> to vector<8x128xf32>
    %363 = vector.broadcast %3 : vector<1x128xf32> to vector<8x128xf32>
    %364 = arith.mulf %363, %311 : vector<8x128xf32>
    %365 = vector.broadcast %5 : vector<1x128xf32> to vector<8x128xf32>
    %366 = arith.mulf %365, %362 : vector<8x128xf32>
    %367 = arith.addf %364, %366 : vector<8x128xf32>
    %368 = vector.broadcast %6 : vector<1x128xf32> to vector<8x128xf32>
    %369 = arith.mulf %368, %317 : vector<8x128xf32>
    %370 = vector.broadcast %8 : vector<1x128xf32> to vector<8x128xf32>
    %371 = arith.mulf %370, %367 : vector<8x128xf32>
    %372 = arith.addf %369, %371 : vector<8x128xf32>
    %373 = arith.subf %372, %328 : vector<8x128xf32>
    %cst_131 = arith.constant 1.000000e+00 : f32
    %374 = vector.broadcast %cst_131 : f32 to vector<8x128xf32>
    %375 = arith.subf %373, %374 : vector<8x128xf32>
    %cst_132 = arith.constant 0.000000e+00 : f32
    %376 = vector.broadcast %cst_132 : f32 to vector<8x128xf32>
    %377 = arith.cmpf ogt, %375, %376 : vector<8x128xf32>
    %cst_133 = arith.constant 2.000000e+00 : f32
    %378 = vector.broadcast %cst_133 : f32 to vector<8x128xf32>
    %379 = arith.mulf %378, %375 : vector<8x128xf32>
    %380 = math.tanh %379 : vector<8x128xf32>
    %cst_134 = arith.constant 5.000000e-01 : f32
    %381 = vector.broadcast %cst_134 : f32 to vector<8x128xf32>
    %382 = arith.mulf %381, %380 : vector<8x128xf32>
    %cst_135 = arith.constant 1.000000e+00 : f32
    %383 = vector.broadcast %cst_135 : f32 to vector<8x128xf32>
    %384 = arith.select %377, %383, %382 : vector<8x128xi1>, vector<8x128xf32>
    %cst_136 = arith.constant dense<0.000000e+00> : vector<8x128xf32>
    %385 = tpu.matmul %384, %15, %cst_136 {dimension_numbers = #tpu.dot_dimension_numbers<[1], [0], [0], [1], [0, 0, 1, 1], [], []>} : vector<8x128xf32>, vector<128x128xf32>, vector<8x128xf32> -> vector<8x128xf32>
    %386 = vector.broadcast %9 : vector<1x128xf32> to vector<8x128xf32>
    %387 = arith.mulf %386, %334 : vector<8x128xf32>
    %388 = vector.broadcast %11 : vector<1x128xf32> to vector<8x128xf32>
    %389 = arith.mulf %388, %385 : vector<8x128xf32>
    %390 = arith.addf %387, %389 : vector<8x128xf32>
    %391 = vector.broadcast %12 : vector<1x128xf32> to vector<8x128xf32>
    %392 = arith.mulf %391, %340 : vector<8x128xf32>
    %393 = vector.broadcast %14 : vector<1x128xf32> to vector<8x128xf32>
    %394 = arith.mulf %393, %390 : vector<8x128xf32>
    %395 = arith.addf %392, %394 : vector<8x128xf32>
    %396 = arith.subf %395, %351 : vector<8x128xf32>
    %cst_137 = arith.constant 1.000000e+00 : f32
    %397 = vector.broadcast %cst_137 : f32 to vector<8x128xf32>
    %398 = arith.subf %396, %397 : vector<8x128xf32>
    %cst_138 = arith.constant 0.000000e+00 : f32
    %399 = vector.broadcast %cst_138 : f32 to vector<8x128xf32>
    %400 = arith.cmpf ogt, %398, %399 : vector<8x128xf32>
    %cst_139 = arith.constant 2.000000e+00 : f32
    %401 = vector.broadcast %cst_139 : f32 to vector<8x128xf32>
    %402 = arith.mulf %401, %398 : vector<8x128xf32>
    %403 = math.tanh %402 : vector<8x128xf32>
    %cst_140 = arith.constant 5.000000e-01 : f32
    %404 = vector.broadcast %cst_140 : f32 to vector<8x128xf32>
    %405 = arith.mulf %404, %403 : vector<8x128xf32>
    %cst_141 = arith.constant 1.000000e+00 : f32
    %406 = vector.broadcast %cst_141 : f32 to vector<8x128xf32>
    %407 = arith.select %400, %406, %405 : vector<8x128xi1>, vector<8x128xf32>
    %408 = arith.addi %16, %c6_i32 : i32
    %c5_i32_142 = arith.constant 5 : i32
    %409 = arith.cmpi sge, %408, %c5_i32_142 : i32
    %c8_i32_143 = arith.constant 8 : i32
    %410 = arith.cmpi slt, %408, %c8_i32_143 : i32
    %411 = arith.andi %409, %410 : i1
    %cst_144 = arith.constant 0.333333343 : f32
    %cst_145 = arith.constant 0.000000e+00 : f32
    %412 = arith.select %411, %cst_144, %cst_145 : f32
    %413 = vector.broadcast %412 : f32 to vector<8x128xf32>
    %414 = arith.mulf %413, %407 : vector<8x128xf32>
    %415 = arith.addf %359, %414 : vector<8x128xf32>
    %c7_i32 = arith.constant 7 : i32
    %416 = arith.index_cast %c7_i32 : i32 to index
    %c0_146 = arith.constant 0 : index
    %c0_147 = arith.constant 0 : index
    %417 = vector.load %arg2[%416, %c0_146, %c0_147] : memref<8x8x128xf32, #tpu.memory_space<vmem>>, vector<1x8x128xf32>
    %418 = vector.shape_cast %417 : vector<1x8x128xf32> to vector<8x128xf32>
    %419 = vector.broadcast %3 : vector<1x128xf32> to vector<8x128xf32>
    %420 = arith.mulf %419, %367 : vector<8x128xf32>
    %421 = vector.broadcast %5 : vector<1x128xf32> to vector<8x128xf32>
    %422 = arith.mulf %421, %418 : vector<8x128xf32>
    %423 = arith.addf %420, %422 : vector<8x128xf32>
    %424 = vector.broadcast %6 : vector<1x128xf32> to vector<8x128xf32>
    %425 = arith.mulf %424, %373 : vector<8x128xf32>
    %426 = vector.broadcast %8 : vector<1x128xf32> to vector<8x128xf32>
    %427 = arith.mulf %426, %423 : vector<8x128xf32>
    %428 = arith.addf %425, %427 : vector<8x128xf32>
    %429 = arith.subf %428, %384 : vector<8x128xf32>
    %cst_148 = arith.constant 1.000000e+00 : f32
    %430 = vector.broadcast %cst_148 : f32 to vector<8x128xf32>
    %431 = arith.subf %429, %430 : vector<8x128xf32>
    %cst_149 = arith.constant 0.000000e+00 : f32
    %432 = vector.broadcast %cst_149 : f32 to vector<8x128xf32>
    %433 = arith.cmpf ogt, %431, %432 : vector<8x128xf32>
    %cst_150 = arith.constant 2.000000e+00 : f32
    %434 = vector.broadcast %cst_150 : f32 to vector<8x128xf32>
    %435 = arith.mulf %434, %431 : vector<8x128xf32>
    %436 = math.tanh %435 : vector<8x128xf32>
    %cst_151 = arith.constant 5.000000e-01 : f32
    %437 = vector.broadcast %cst_151 : f32 to vector<8x128xf32>
    %438 = arith.mulf %437, %436 : vector<8x128xf32>
    %cst_152 = arith.constant 1.000000e+00 : f32
    %439 = vector.broadcast %cst_152 : f32 to vector<8x128xf32>
    %440 = arith.select %433, %439, %438 : vector<8x128xi1>, vector<8x128xf32>
    %cst_153 = arith.constant dense<0.000000e+00> : vector<8x128xf32>
    %441 = tpu.matmul %440, %15, %cst_153 {dimension_numbers = #tpu.dot_dimension_numbers<[1], [0], [0], [1], [0, 0, 1, 1], [], []>} : vector<8x128xf32>, vector<128x128xf32>, vector<8x128xf32> -> vector<8x128xf32>
    %442 = vector.broadcast %9 : vector<1x128xf32> to vector<8x128xf32>
    %443 = arith.mulf %442, %390 : vector<8x128xf32>
    %444 = vector.broadcast %11 : vector<1x128xf32> to vector<8x128xf32>
    %445 = arith.mulf %444, %441 : vector<8x128xf32>
    %446 = arith.addf %443, %445 : vector<8x128xf32>
    %447 = vector.broadcast %12 : vector<1x128xf32> to vector<8x128xf32>
    %448 = arith.mulf %447, %396 : vector<8x128xf32>
    %449 = vector.broadcast %14 : vector<1x128xf32> to vector<8x128xf32>
    %450 = arith.mulf %449, %446 : vector<8x128xf32>
    %451 = arith.addf %448, %450 : vector<8x128xf32>
    %452 = arith.subf %451, %407 : vector<8x128xf32>
    %cst_154 = arith.constant 1.000000e+00 : f32
    %453 = vector.broadcast %cst_154 : f32 to vector<8x128xf32>
    %454 = arith.subf %452, %453 : vector<8x128xf32>
    %cst_155 = arith.constant 0.000000e+00 : f32
    %455 = vector.broadcast %cst_155 : f32 to vector<8x128xf32>
    %456 = arith.cmpf ogt, %454, %455 : vector<8x128xf32>
    %cst_156 = arith.constant 2.000000e+00 : f32
    %457 = vector.broadcast %cst_156 : f32 to vector<8x128xf32>
    %458 = arith.mulf %457, %454 : vector<8x128xf32>
    %459 = math.tanh %458 : vector<8x128xf32>
    %cst_157 = arith.constant 5.000000e-01 : f32
    %460 = vector.broadcast %cst_157 : f32 to vector<8x128xf32>
    %461 = arith.mulf %460, %459 : vector<8x128xf32>
    %cst_158 = arith.constant 1.000000e+00 : f32
    %462 = vector.broadcast %cst_158 : f32 to vector<8x128xf32>
    %463 = arith.select %456, %462, %461 : vector<8x128xi1>, vector<8x128xf32>
    %464 = arith.addi %16, %c7_i32 : i32
    %c5_i32_159 = arith.constant 5 : i32
    %465 = arith.cmpi sge, %464, %c5_i32_159 : i32
    %c8_i32_160 = arith.constant 8 : i32
    %466 = arith.cmpi slt, %464, %c8_i32_160 : i32
    %467 = arith.andi %465, %466 : i1
    %cst_161 = arith.constant 0.333333343 : f32
    %cst_162 = arith.constant 0.000000e+00 : f32
    %468 = arith.select %467, %cst_161, %cst_162 : f32
    %469 = vector.broadcast %468 : f32 to vector<8x128xf32>
    %470 = arith.mulf %469, %463 : vector<8x128xf32>
    %471 = arith.addf %415, %470 : vector<8x128xf32>
    %c8_i32_163 = arith.constant 8 : i32
    %c0_164 = arith.constant 0 : index
    %c0_165 = arith.constant 0 : index
    %472 = vector.load %arg11[%c0_164, %c0_165] : memref<8x128xf32, #tpu.memory_space<vmem>>, vector<8x128xf32>
    tpu.vector_store %arg11[%c0_164, %c0_165], %423 {strides = array<i32>} : memref<8x128xf32, #tpu.memory_space<vmem>>, vector<8x128xf32>,
    %c0_166 = arith.constant 0 : index
    %c0_167 = arith.constant 0 : index
    %473 = vector.load %arg12[%c0_166, %c0_167] : memref<8x128xf32, #tpu.memory_space<vmem>>, vector<8x128xf32>
    tpu.vector_store %arg12[%c0_166, %c0_167], %429 {strides = array<i32>} : memref<8x128xf32, #tpu.memory_space<vmem>>, vector<8x128xf32>,
    %c0_168 = arith.constant 0 : index
    %c0_169 = arith.constant 0 : index
    %474 = vector.load %arg13[%c0_168, %c0_169] : memref<8x128xf32, #tpu.memory_space<vmem>>, vector<8x128xf32>
    tpu.vector_store %arg13[%c0_168, %c0_169], %440 {strides = array<i32>} : memref<8x128xf32, #tpu.memory_space<vmem>>, vector<8x128xf32>,
    %c0_170 = arith.constant 0 : index
    %c0_171 = arith.constant 0 : index
    %475 = vector.load %arg14[%c0_170, %c0_171] : memref<8x128xf32, #tpu.memory_space<vmem>>, vector<8x128xf32>
    tpu.vector_store %arg14[%c0_170, %c0_171], %446 {strides = array<i32>} : memref<8x128xf32, #tpu.memory_space<vmem>>, vector<8x128xf32>,
    %c0_172 = arith.constant 0 : index
    %c0_173 = arith.constant 0 : index
    %476 = vector.load %arg15[%c0_172, %c0_173] : memref<8x128xf32, #tpu.memory_space<vmem>>, vector<8x128xf32>
    tpu.vector_store %arg15[%c0_172, %c0_173], %452 {strides = array<i32>} : memref<8x128xf32, #tpu.memory_space<vmem>>, vector<8x128xf32>,
    %c0_174 = arith.constant 0 : index
    %c0_175 = arith.constant 0 : index
    %477 = vector.load %arg16[%c0_174, %c0_175] : memref<8x128xf32, #tpu.memory_space<vmem>>, vector<8x128xf32>
    tpu.vector_store %arg16[%c0_174, %c0_175], %463 {strides = array<i32>} : memref<8x128xf32, #tpu.memory_space<vmem>>, vector<8x128xf32>,
    %c0_176 = arith.constant 0 : index
    %c0_177 = arith.constant 0 : index
    %478 = vector.load %arg10[%c0_176, %c0_177] : memref<8x128xf32, #tpu.memory_space<vmem>>, vector<8x128xf32>
    tpu.vector_store %arg10[%c0_176, %c0_177], %471 {strides = array<i32>} : memref<8x128xf32, #tpu.memory_space<vmem>>, vector<8x128xf32>,
    return
  }
  func.func @transform_0(%arg0: i32, %arg1: i32) -> (i32, i32, i32) {
    %c0_i32 = arith.constant 0 : i32
    %c0_i32_0 = arith.constant 0 : i32
    return %arg1, %arg0, %c0_i32 : i32, i32, i32
  }
  func.func @transform_1(%arg0: i32, %arg1: i32) -> (i32, i32) {
    %c0_i32 = arith.constant 0 : i32
    %c0_i32_0 = arith.constant 0 : i32
    %c0_i32_1 = arith.constant 0 : i32
    return %c0_i32, %c0_i32_0 : i32, i32
  }
  func.func @transform_2(%arg0: i32, %arg1: i32) -> (i32, i32) {
    %c0_i32 = arith.constant 0 : i32
    %c0_i32_0 = arith.constant 0 : i32
    %c0_i32_1 = arith.constant 0 : i32
    return %c0_i32, %c0_i32_0 : i32, i32
  }
  func.func @transform_3(%arg0: i32, %arg1: i32) -> (i32, i32) {
    %c0_i32 = arith.constant 0 : i32
    %c0_i32_0 = arith.constant 0 : i32
    %c0_i32_1 = arith.constant 0 : i32
    return %c0_i32, %c0_i32_0 : i32, i32
  }
  func.func @transform_4(%arg0: i32, %arg1: i32) -> (i32, i32) {
    %c0_i32 = arith.constant 0 : i32
    %c0_i32_0 = arith.constant 0 : i32
    %c0_i32_1 = arith.constant 0 : i32
    return %c0_i32, %c0_i32_0 : i32, i32
  }
  func.func @transform_5(%arg0: i32, %arg1: i32) -> (i32, i32) {
    %c0_i32 = arith.constant 0 : i32
    %c0_i32_0 = arith.constant 0 : i32
    %c0_i32_1 = arith.constant 0 : i32
    return %c0_i32, %c0_i32_0 : i32, i32
  }
  func.func @transform_6(%arg0: i32, %arg1: i32) -> (i32, i32) {
    %c0_i32 = arith.constant 0 : i32
    %c0_i32_0 = arith.constant 0 : i32
    return %arg0, %c0_i32 : i32, i32
  }
  func.func @transform_7(%arg0: i32, %arg1: i32) -> (i32, i32) {
    %c0_i32 = arith.constant 0 : i32
    %c0_i32_0 = arith.constant 0 : i32
    return %arg0, %c0_i32 : i32, i32
  }
  func.func @transform_8(%arg0: i32, %arg1: i32) -> (i32, i32) {
    %c0_i32 = arith.constant 0 : i32
    %c0_i32_0 = arith.constant 0 : i32
    return %arg0, %c0_i32 : i32, i32
  }
}

</mosaic_0001>

<bundles_post_ra>
// kernel: tpu_custom_call.1
= control target key start
LH: loop header
LB: loop body
LE: loop exit
PB: predicated region body
PF: predicated region fallthrough
CT: control target
= control target key end

     0   :  { %13 = vsyncpa [#allocation9], 0  ;;  %s2162_s0 = inlined_call_operand.hbm [shape: f32[8,8,128], index: 0, kind: input, shape index: {}]   ;;  %s2163_s1 = inlined_call_operand.vmem [shape: f32[1,128], index: 1, kind: input, shape index: {}]   ;;  %s2164_s2 = inlined_call_operand.vmem [shape: f32[1,128], index: 2, kind: input, shape index: {}]   ;;  %s2165_s3 = inlined_call_operand.hbm [shape: f32[1,128], index: 3, kind: input, shape index: {}]   ;;  %s2166_s4 = inlined_call_operand.hbm [shape: f32[1,128], index: 4, kind: input, shape index: {}]   ;;  %s2167_s5 = inlined_call_operand.hbm [shape: f32[128,128], index: 5, kind: input, shape index: {}]   ;;  %s2168_s6 = inlined_call_operand.vmem [shape: f32[8,128], index: 6, kind: input, shape index: {}]   ;;  %s2169_s7 = inlined_call_operand.hbm [shape: f32[8,128], index: 7, kind: input, shape index: {}]   ;;  %s2170_s8 = inlined_call_operand.hbm [shape: f32[8,128], index: 8, kind: output, shape index: {}]  }
   0x1   :  { %14 = vsyncpa [#allocation12], 0 }
   0x2   :  { %15 = vsyncpa [#allocation15], 0 }
   0x3   :  { %16 = vsyncpa [#allocation10], 0  ;;  %s1663_s27 = smov [#allocation11]  }
   0x4   :  { %s39_s28 = sshll.u32 %s1663_s27, 4  ;;  %s40_s28 = int_to_ptr.vmem [resolvable:$true] %s39_s28 }
   0x5   :  { %s1543_s29 = scalar_lea.vmem %s40_s28, 16  ;;  %s1547_s30 = scalar_lea.vmem %s40_s28, 32 }
   0x6   :  { %p1544_p0 = scmp.ne.s32.totalorder %s40_s28, %s1543_s29  ;;  %p1548_p1 = scmp.lt.s32.totalorder %s40_s28, %s40_s28 }
   0x7   :  { %p1549_p2 = scmp.lt.s32.totalorder %s1547_s30, %s1543_s29 }
   0x9   :  { %p1550_p3 = por %p1549_p2, %p1548_p1 }
   0xb   :  { %p1551_p4 = pnand %p1550_p3, %p1544_p0 }
   0xd   :  { %1554 = shalt.err (!%p1551_p4)
}
   0xe   :  { %42 = dma.hbm_to_vmem [thread:$0]  %s2165_s3, 16, %s40_s28, [#allocation12]  }
   0xf   :  { %s1664_s11 = smov [#allocation14]   ;;  %s1665_s13 = smov [#allocation8]  }
  0x10   :  { %s58_s12 = sshll.u32 %s1664_s11, 4  ;;  %s22_s14 = sshll.u32 %s1665_s13, 4  ;;  %s59_s12 = int_to_ptr.vmem [resolvable:$true] %s58_s12  ;;  %s23_s14 = int_to_ptr.vmem [resolvable:$true] %s22_s14 }
  0x11   :  { %s1563_s15 = scalar_lea.vmem %s59_s12, 2048  ;;  %p1568_p6 = scmp.lt.s32.totalorder %s59_s12, %s59_s12 }
  0x12   :  { %p1564_p5 = scmp.ne.s32.totalorder %s59_s12, %s1563_s15  ;;  %p1569_p7 = scmp.lt.s32.totalorder %s1563_s15, %s1563_s15 }
  0x14   :  { %p1570_p8 = por %p1569_p7, %p1568_p6 }
  0x16   :  { %p1571_p9 = pnand %p1570_p8, %p1564_p5 }
  0x18   :  { %1574 = shalt.err (!%p1571_p9)
}
  0x19   :  { %s1666_s16 = smov 128   ;;  %s1667_s17 = smov 8  }
  0x1a   :  { %64 = dma.hbm_to_vmem [thread:$0]  %s2167_s5, 2048, %s59_s12, [#allocation15], %s1666_s16, %s1666_s16, %s1667_s17  }
  0x1b   :  { %s1583_s3 = scalar_lea.vmem %s23_s14, 1024  ;;  %p1588_p11 = scmp.lt.s32.totalorder %s23_s14, %s23_s14 }
  0x1c   :  { %p1584_p10 = scmp.ne.s32.totalorder %s23_s14, %s1583_s3  ;;  %p1589_p12 = scmp.lt.s32.totalorder %s1583_s3, %s1583_s3 }
  0x1e   :  { %p1590_p13 = por %p1589_p12, %p1588_p11 }
  0x20   :  { %p1591_p0 = pnand %p1590_p13, %p1584_p10 }
  0x22   :  { %1594 = shalt.err (!%p1591_p0)
}
  0x23   :  { %28 = dma.hbm_to_vmem [thread:$0]  %s2162_s0, 1024, %s23_s14, [#allocation9], %s1666_s16, %s1666_s16, %s1667_s17  }
  0x24   :  { %s1668_s22 = smov [#allocation13]   ;;  %s1669_s24 = smov [#allocation16]  }
  0x25   :  { %s49_s23 = sshll.u32 %s1668_s22, 4  ;;  %s73_s25 = sshll.u32 %s1669_s24, 4  ;;  %s50_s23 = int_to_ptr.vmem [resolvable:$true] %s49_s23  ;;  %s74_s25 = int_to_ptr.vmem [resolvable:$true] %s73_s25 }
  0x26   :  { %s1603_s26 = scalar_lea.vmem %s50_s23, 16  ;;  %s1607_s5 = scalar_lea.vmem %s50_s23, 32 }
  0x27   :  { %p1604_p1 = scmp.ne.s32.totalorder %s50_s23, %s1603_s26  ;;  %p1608_p2 = scmp.lt.s32.totalorder %s50_s23, %s50_s23 }
  0x28   :  { %p1609_p3 = scmp.lt.s32.totalorder %s1607_s5, %s1603_s26 }
  0x2a   :  { %p1610_p4 = por %p1609_p3, %p1608_p2 }
  0x2c   :  { %p1611_p5 = pnand %p1610_p4, %p1604_p1 }
  0x2e   :  { %1614 = shalt.err (!%p1611_p5)
}
  0x2f   :  { %52 = dma.hbm_to_vmem [thread:$0]  %s2166_s4, 16, %s50_s23, [#allocation12]  }
  0x30   :  { %s1623_s29 = scalar_lea.vmem %s74_s25, 128  ;;  %p1628_p7 = scmp.lt.s32.totalorder %s74_s25, %s74_s25 }
  0x31   :  { %p1624_p6 = scmp.ne.s32.totalorder %s74_s25, %s1623_s29  ;;  %p1629_p8 = scmp.lt.s32.totalorder %s1623_s29, %s1623_s29 }
  0x33   :  { %p1630_p9 = por %p1629_p8, %p1628_p7 }
  0x35   :  { %p1631_p10 = pnand %p1630_p9, %p1624_p6 }
  0x37   :  { %1634 = shalt.err (!%p1631_p10)
}
  0x38   :  { %76 = dma.hbm_to_vmem [thread:$0]  %s2169_s7, 128, %s74_s25, [#allocation15]  }
  0x39   :  { %1655 = dma.done.wait [#allocation9], 1024  }
  0x3a   :  { %1656 = vsyncadd [#allocation9], 4294966272 }
  0x3b   :  { %1657 = dma.done.wait [#allocation12], 32  }
  0x3c   :  { %1658 = vsyncadd [#allocation12], 4294967264 }
  0x3d   :  { %1659 = dma.done.wait [#allocation15], 2176  }
  0x3e   :  { %1660 = vsyncadd [#allocation15], 4294965120  ;;  %v1670_v0 = vmov 0.0   ;;  %v137_v1 = vlaneseq  ;;  %vm1671_vm0 = vmmov 0   ;;  %v1739_v3 = vld [vmem:[#allocation14 + $0x78] sm:$0xff]  ;;  %v1741_v4 = vld [vmem:[#allocation14 + $0x70] sm:$0xff] }
  0x3f   :  { %1213 = vmatprep.subr.mxu0 %v1670_v0  ;;  %1248 = vmatprep.subr.mxu1 %v1670_v0  ;;  %v1746_v5 = vld [vmem:[#allocation14 + $0x68] sm:$0xff]  ;;  %v1754_v7 = vld [vmem:[#allocation14 + $0x60] sm:$0xff]  ;;  %v104_v8 = vld [vmem:[%s2163_s1] sm:$0x1] }
  0x40   :  { %1245 = vmatprep.mubr.msk.f32.mxu0 %vm1671_vm0, %v1670_v0  ;;  %1280 = vmatprep.mubr.msk.f32.mxu1 %vm1671_vm0, %v1670_v0  ;;  %v138_v2 = vshrl.u32 %v137_v1, 7  ;;  %v1763_v9 = vld [vmem:[#allocation14 + $0x58] sm:$0xff]  ;;  %v105_v10 = vsub.f32 1.0, %v104_v8  ;;  %v1775_v15 = vld [vmem:[#allocation14 + $0x50] sm:$0xff]  ;;  %v289_v20 = vld [vmem:[#allocation8 + $0x8] sm:$0xff] }
  0x41   :  { %1214 = vmatpush3.msra.mxu0 %v1739_v3  ;;  %1249 = vmatpush3.msra.mxu1 %v1739_v3  ;;  %v106_v11 = vld [vmem:[%s2164_s2] sm:$0x1]  ;;  %v1791_v21 = vld [vmem:[#allocation14 + $0x48] sm:$0xff]  ;;  %v1801_v24 = vld [vmem:[#allocation14 + $0x40] sm:$0xff] }
  0x42   :  { %1215 = vmatprep.subr.mxu0 %v1670_v0  ;;  %1250 = vmatprep.subr.mxu1 %v1670_v0  ;;  %v1749_v6 = vsub.s32 0, %v138_v2  ;;  %v107_v13 = vsub.f32 1.0, %v106_v11  ;;  %v135_v14 = vld [vmem:[#allocation8] sm:$0xff]  ;;  %v396_v28 = vld [vmem:[#allocation8 + $0x10] sm:$0xff]  ;;  %v503_v36 = vld [vmem:[#allocation8 + $0x18] sm:$0xff] }
  0x43   :  { %1216 = vmatpush3.msra.mxu0 %v1741_v4  ;;  %1251 = vmatpush3.msra.mxu1 %v1741_v4  ;;  %v97_v19 = vld [vmem:[%s2168_s6] sm:$0xff]  ;;  %v1817_v32 = vld [vmem:[#allocation14 + $0x30] sm:$0xff]  ;;  %v1824_v37 = vld [vmem:[#allocation14 + $0x28] sm:$0xff]  ;;  %s1672_s6 = smov [#allocation17]  }
  0x44   :  { %1217 = vmatprep.subr.mxu0 %v1670_v0  ;;  %1252 = vmatprep.subr.mxu1 %v1670_v0  ;;  %v1770_v12 = vrot.slane %v104_v8, %v1749_v6  ;;  %v1780_v17 = vrot.slane %v105_v10, %v1749_v6  ;;  %v1783_v18 = vrot.slane %v106_v11, %v1749_v6  ;;  %v1809_v29 = vld [vmem:[#allocation14 + $0x38] sm:$0xff]  ;;  %v1833_v40 = vld [vmem:[#allocation14 + $0x20] sm:$0xff]  ;;  %v1851_v47 = vld [vmem:[#allocation14 + $0x10] sm:$0xff]  ;;  %s1050_s11 = sshll.u32 %s1672_s6, 4  ;;  %s1051_s11 = int_to_ptr.vmem [resolvable:$true] %s1050_s11 }
  0x45   :  { %1218 = vmatpush3.msra.mxu0 %v1746_v5  ;;  %1253 = vmatpush3.msra.mxu1 %v1746_v5  ;;  %v1795_v23 = vrot.slane %v107_v13, %v1749_v6  ;;  %v610_v44 = vld [vmem:[#allocation8 + $0x20] sm:$0xff]  ;;  %v717_v50 = vld [vmem:[#allocation8 + $0x28] sm:$0xff]  ;;  %v824_v57 = vld [vmem:[#allocation8 + $0x30] sm:$0xff]  ;;  %s1635_s12 = scalar_lea.vmem %s1051_s11, 128  ;;  %p1640_p12 = scmp.lt.s32.totalorder %s1051_s11, %s1051_s11 }
  0x46   :  { %1219 = vmatprep.subr.mxu0 %v1670_v0  ;;  %1254 = vmatprep.subr.mxu1 %v1670_v0  ;;  %v142_v16 = vmul.f32 0.0, %v1770_v12  ;;  %v149_v22 = vmul.f32 %v1780_v17, %v135_v14  ;;  %v157_v26 = vmul.f32 %v1783_v18, %v97_v19  ;;  %v291_v27 = vmul.f32 %v289_v20, %v1780_v17  ;;  %v1843_v45 = vld [vmem:[#allocation14 + $0x18] sm:$0xff]  ;;  %v1858_v51 = vld [vmem:[#allocation14 + $0x8] sm:$0xff]  ;;  %v1868_v54 = vld [vmem:[#allocation14] sm:$0xff]  ;;  %p1636_p11 = scmp.ne.s32.totalorder %s1051_s11, %s1635_s12  ;;  %p1641_p13 = scmp.lt.s32.totalorder %s1635_s12, %s1635_s12 }
  0x47   :  { %1220 = vmatpush3.msra.mxu0 %v1754_v7  ;;  %1255 = vmatpush3.msra.mxu1 %v1754_v7  ;;  %v398_v35 = vmul.f32 %v396_v28, %v1780_v17  ;;  %v505_v43 = vmul.f32 %v503_v36, %v1780_v17  ;;  %v612_v49 = vmul.f32 %v610_v44, %v1780_v17  ;;  %v931_v20 = vld [vmem:[#allocation8 + $0x38] sm:$0xff] }
  0x48   :  { %1221 = vmatprep.subr.mxu0 %v1670_v0  ;;  %1256 = vmatprep.subr.mxu1 %v1670_v0  ;;  %v150_v25 = vadd.f32 %v149_v22, %v142_v16  ;;  %v719_v56 = vmul.f32 %v717_v50, %v1780_v17  ;;  %v826_v63 = vmul.f32 %v824_v57, %v1780_v17  ;;  %p1642_p0 = por %p1641_p13, %p1640_p12 }
  0x49   :  { %1222 = vmatpush3.msra.mxu0 %v1763_v9  ;;  %1257 = vmatpush3.msra.mxu1 %v1763_v9 }
  0x4a   :  { %1223 = vmatprep.subr.mxu0 %v1670_v0  ;;  %1258 = vmatprep.subr.mxu1 %v1670_v0  ;;  %v164_v30 = vmul.f32 %v1795_v23, %v150_v25  ;;  %v290_v31 = vmul.f32 %v150_v25, %v1770_v12  ;;  %p1643_p1 = pnand %p1642_p0, %p1636_p11 }
  0x4b   :  { %1224 = vmatpush3.msra.mxu0 %v1775_v15  ;;  %1259 = vmatpush3.msra.mxu1 %v1775_v15 }
  0x4c   :  { %1225 = vmatprep.subr.mxu0 %v1670_v0  ;;  %1260 = vmatprep.subr.mxu1 %v1670_v0  ;;  %v165_v33 = vadd.f32 %v164_v30, %v157_v26  ;;  %v292_v34 = vadd.f32 %v291_v27, %v290_v31  ;;  %v933_v26 = vmul.f32 %v931_v20, %v1780_v17 }
  0x4d   :  { %1226 = vmatpush3.msra.mxu0 %v1791_v21  ;;  %1261 = vmatpush3.msra.mxu1 %v1791_v21 }
  0x4e   :  { %1227 = vmatprep.subr.mxu0 %v1670_v0  ;;  %1262 = vmatprep.subr.mxu1 %v1670_v0  ;;  %v1826_v38 = vadd.f32 -1.0, %v165_v33  ;;  %v397_v39 = vmul.f32 %v292_v34, %v1770_v12  ;;  %v293_v60 = vmul.f32 %v165_v33, %v1783_v18  ;;  %v294_v61 = vmul.f32 %v292_v34, %v1795_v23 }
  0x4f   :  { %1228 = vmatpush3.msra.mxu0 %v1801_v24  ;;  %1263 = vmatpush3.msra.mxu1 %v1801_v24 }
  0x50   :  { %1229 = vmatprep.subr.mxu0 %v1670_v0  ;;  %1264 = vmatprep.subr.mxu1 %v1670_v0  ;;  %v169_v41 = vmul.f32 2.0, %v1826_v38  ;;  %v1837_v42 = vadd.f32 %v398_v35, %v397_v39  ;;  %vm168_vm1 = vcmp.gt.f32.partialorder %v1826_v38, 0.0  ;;  %v295_v10 = vadd.f32 %v294_v61, %v293_v60 }
  0x51   :  { %1230 = vmatpush3.msra.mxu0 %v1809_v29  ;;  %1265 = vmatpush3.msra.mxu1 %v1809_v29 }
  0x52   :  { %1231 = vmatprep.subr.mxu0 %v1670_v0  ;;  %1266 = vmatprep.subr.mxu1 %v1670_v0  ;;  %1503 = vtanh.f32 %v169_v41  ;;  %v504_v46 = vmul.f32 %v1837_v42, %v1770_v12  ;;  %v401_v17 = vmul.f32 %v1837_v42, %v1795_v23 }
  0x53   :  { %1232 = vmatpush3.msra.mxu0 %v1817_v32  ;;  %1267 = vmatpush3.msra.mxu1 %v1817_v32 }
  0x54   :  { %1233 = vmatprep.subr.mxu0 %v1670_v0  ;;  %1268 = vmatprep.subr.mxu1 %v1670_v0  ;;  %v506_v48 = vadd.f32 %v505_v43, %v504_v46 }
  0x55   :  { %1234 = vmatpush3.msra.mxu0 %v1824_v37  ;;  %1269 = vmatpush3.msra.mxu1 %v1824_v37 }
  0x56   :  { %1235 = vmatprep.subr.mxu0 %v1670_v0  ;;  %1270 = vmatprep.subr.mxu1 %v1670_v0  ;;  %v1862_v52 = vmul.f32 %v506_v48, %v1795_v23  ;;  %v611_v53 = vmul.f32 %v506_v48, %v1770_v12 }
  0x57   :  { %1236 = vmatpush3.msra.mxu0 %v1833_v40  ;;  %1271 = vmatpush3.msra.mxu1 %v1833_v40 }
  0x58   :  { %1237 = vmatprep.subr.mxu0 %v1670_v0  ;;  %1272 = vmatprep.subr.mxu1 %v1670_v0  ;;  %v613_v55 = vadd.f32 %v612_v49, %v611_v53 }
  0x59   :  { %1238 = vmatpush3.msra.mxu0 %v1843_v45  ;;  %1273 = vmatpush3.msra.mxu1 %v1843_v45 }
  0x5a   :  { %1239 = vmatprep.subr.mxu0 %v1670_v0  ;;  %1274 = vmatprep.subr.mxu1 %v1670_v0  ;;  %v1877_v58 = vmul.f32 %v613_v55, %v1795_v23  ;;  %v718_v59 = vmul.f32 %v613_v55, %v1770_v12 }
  0x5b   :  { %1240 = vmatpush3.msra.mxu0 %v1851_v47  ;;  %1275 = vmatpush3.msra.mxu1 %v1851_v47 }
  0x5c   :  { %1241 = vmatprep.subr.mxu0 %v1670_v0  ;;  %1276 = vmatprep.subr.mxu1 %v1670_v0  ;;  %v720_v62 = vadd.f32 %v719_v56, %v718_v59 }
  0x5d   :  { %1242 = vmatpush3.msra.mxu0 %v1858_v51  ;;  %1277 = vmatpush3.msra.mxu1 %v1858_v51 }
  0x5e   :  { %1243 = vmatprep.subr.mxu0 %v1670_v0  ;;  %1278 = vmatprep.subr.mxu1 %v1670_v0  ;;  %v1888_v1 = vmul.f32 %v720_v62, %v1795_v23  ;;  %v825_v2 = vmul.f32 %v720_v62, %v1770_v12 }
  0x5f   :  { %1244 = vmatpush3.msra.mxu0 %v1868_v54  ;;  %1279 = vmatpush3.msra.mxu1 %v1868_v54  ;;  %v1504_v8 = vpop.eup %1503 }
  0x60   :  { %1283 = vmatprep.subr.mxu0 %v1670_v0  ;;  %1318 = vmatprep.subr.mxu1 %v1670_v0  ;;  %v171_v11 = vmul.f32 0.5, %v1504_v8  ;;  %v827_v13 = vadd.f32 %v826_v63, %v825_v2 }
  0x62   :  { %v172_v14 = vsel %vm168_vm1, 1.0, %v171_v11  ;;  %v1893_v16 = vmul.f32 %v827_v13, %v1795_v23  ;;  %v932_v25 = vmul.f32 %v827_v13, %v1770_v12 }
  0x63   :  { %1246 = vmatmul.mubr.f32.vlgmr.msra.gmra.mxu0 %v172_v14  ;;  %v296_v19 = vsub.f32 %v295_v10, %v172_v14 }
  0x64   :  { %1284 = vmatpush3.msra.mxu0 %v1739_v3  ;;  %1315 = vmatprep.mubr.msk.f32.mxu0 %vm1671_vm0, %v1670_v0  ;;  %v934_v28 = vadd.f32 %v933_v26, %v932_v25 }
  0x65   :  { %1285 = vmatprep.subr.mxu0 %v1670_v0  ;;  %v1063_v22 = vadd.f32 -1.0, %v296_v19  ;;  %v400_v12 = vmul.f32 %v296_v19, %v1783_v18 }
  0x66   :  { %1286 = vmatpush3.msra.mxu0 %v1741_v4  ;;  %v1906_v30 = vmul.f32 %v934_v28, %v1795_v23 }
  0x67   :  { %1287 = vmatprep.subr.mxu0 %v1670_v0  ;;  %v299_v27 = vmul.f32 2.0, %v1063_v22  ;;  %vm298_vm2 = vcmp.gt.f32.partialorder %v1063_v22, 0.0  ;;  %v402_v33 = vadd.f32 %v401_v17, %v400_v12 }
  0x68   :  { %1288 = vmatpush3.msra.mxu0 %v1746_v5 }
  0x69   :  { %1289 = vmatprep.subr.mxu0 %v1670_v0  ;;  %1505 = vtanh.f32 %v299_v27 }
  0x6a   :  { %1290 = vmatpush3.msra.mxu0 %v1754_v7 }
  0x6b   :  { %1291 = vmatprep.subr.mxu0 %v1670_v0 }
  0x6c   :  { %1292 = vmatpush3.msra.mxu0 %v1763_v9 }
  0x6d   :  { %1293 = vmatprep.subr.mxu0 %v1670_v0 }
  0x6e   :  { %1294 = vmatpush3.msra.mxu0 %v1775_v15 }
  0x6f   :  { %1295 = vmatprep.subr.mxu0 %v1670_v0 }
  0x70   :  { %1296 = vmatpush3.msra.mxu0 %v1791_v21 }
  0x71   :  { %1297 = vmatprep.subr.mxu0 %v1670_v0 }
  0x72   :  { %1298 = vmatpush3.msra.mxu0 %v1801_v24 }
  0x73   :  { %1299 = vmatprep.subr.mxu0 %v1670_v0 }
  0x74   :  { %1300 = vmatpush3.msra.mxu0 %v1809_v29 }
  0x75   :  { %1301 = vmatprep.subr.mxu0 %v1670_v0 }
  0x76   :  { %v1506_v31 = vpop.eup %1505  ;;  %1302 = vmatpush3.msra.mxu0 %v1817_v32 }
  0x77   :  { %v301_v34 = vmul.f32 0.5, %v1506_v31  ;;  %1303 = vmatprep.subr.mxu0 %v1670_v0 }
  0x78   :  { %1304 = vmatpush3.msra.mxu0 %v1824_v37 }
  0x79   :  { %v302_v35 = vsel %vm298_vm2, 1.0, %v301_v34  ;;  %1305 = vmatprep.subr.mxu0 %v1670_v0 }
  0x7a   :  { %1281 = vmatmul.mubr.f32.vlgmr.msra.gmra.mxu1 %v302_v35  ;;  %v403_v23 = vsub.f32 %v402_v33, %v302_v35  ;;  %1306 = vmatpush3.msra.mxu0 %v1833_v40 }
  0x7b   :  { %1307 = vmatprep.subr.mxu0 %v1670_v0  ;;  %1319 = vmatpush3.msra.mxu1 %v1739_v3 }
  0x7c   :  { %v1065_v36 = vadd.f32 -1.0, %v403_v23  ;;  %1308 = vmatpush3.msra.mxu0 %v1843_v45  ;;  %1320 = vmatprep.subr.mxu1 %v1670_v0  ;;  %v507_v39 = vmul.f32 %v403_v23, %v1783_v18 }
  0x7d   :  { %1309 = vmatprep.subr.mxu0 %v1670_v0  ;;  %1321 = vmatpush3.msra.mxu1 %v1741_v4 }
  0x7e   :  { %v406_v38 = vmul.f32 2.0, %v1065_v36  ;;  %1310 = vmatpush3.msra.mxu0 %v1851_v47  ;;  %1322 = vmatprep.subr.mxu1 %v1670_v0  ;;  %vm405_vm3 = vcmp.gt.f32.partialorder %v1065_v36, 0.0  ;;  %v509_v42 = vadd.f32 %v1862_v52, %v507_v39 }
  0x7f   :  { %1311 = vmatprep.subr.mxu0 %v1670_v0  ;;  %1323 = vmatpush3.msra.mxu1 %v1746_v5 }
  0x80   :  { %1507 = vtanh.f32 %v406_v38  ;;  %1312 = vmatpush3.msra.mxu0 %v1858_v51  ;;  %1324 = vmatprep.subr.mxu1 %v1670_v0 }
  0x81   :  { %1313 = vmatprep.subr.mxu0 %v1670_v0  ;;  %1325 = vmatpush3.msra.mxu1 %v1754_v7 }
  0x82   :  { %1314 = vmatpush3.msra.mxu0 %v1868_v54  ;;  %1326 = vmatprep.subr.mxu1 %v1670_v0 }
  0x83   :  { %1327 = vmatpush3.msra.mxu1 %v1763_v9  ;;  %1353 = vmatprep.subr.mxu0 %v1670_v0 }
  0x84   :  { %1328 = vmatprep.subr.mxu1 %v1670_v0  ;;  %1350 = vmatprep.mubr.msk.f32.mxu1 %vm1671_vm0, %v1670_v0 }
  0x85   :  { %1329 = vmatpush3.msra.mxu1 %v1775_v15 }
  0x86   :  { %1330 = vmatprep.subr.mxu1 %v1670_v0 }
  0x87   :  { %1331 = vmatpush3.msra.mxu1 %v1791_v21 }
  0x88   :  { %1332 = vmatprep.subr.mxu1 %v1670_v0 }
  0x89   :  { %1333 = vmatpush3.msra.mxu1 %v1801_v24 }
  0x8a   :  { %1334 = vmatprep.subr.mxu1 %v1670_v0 }
  0x8b   :  { %1335 = vmatpush3.msra.mxu1 %v1809_v29 }
  0x8c   :  { %1336 = vmatprep.subr.mxu1 %v1670_v0 }
  0x8d   :  { %v1508_v41 = vpop.eup %1507  ;;  %1337 = vmatpush3.msra.mxu1 %v1817_v32 }
  0x8e   :  { %v408_v43 = vmul.f32 0.5, %v1508_v41  ;;  %1338 = vmatprep.subr.mxu1 %v1670_v0 }
  0x8f   :  { %1339 = vmatpush3.msra.mxu1 %v1824_v37 }
  0x90   :  { %v409_v44 = vsel %vm405_vm3, 1.0, %v408_v43  ;;  %1340 = vmatprep.subr.mxu1 %v1670_v0 }
  0x91   :  { %1316 = vmatmul.mubr.f32.vlgmr.msra.gmra.mxu0 %v409_v44  ;;  %v510_v46 = vsub.f32 %v509_v42, %v409_v44  ;;  %1341 = vmatpush3.msra.mxu1 %v1833_v40 }
  0x92   :  { %1342 = vmatprep.subr.mxu1 %v1670_v0  ;;  %1354 = vmatpush3.msra.mxu0 %v1739_v3 }
  0x93   :  { %v614_v48 = vmul.f32 %v510_v46, %v1783_v18  ;;  %1343 = vmatpush3.msra.mxu1 %v1843_v45  ;;  %1355 = vmatprep.subr.mxu0 %v1670_v0  ;;  %v1067_v49 = vadd.f32 -1.0, %v510_v46 }
  0x94   :  { %1344 = vmatprep.subr.mxu1 %v1670_v0  ;;  %1356 = vmatpush3.msra.mxu0 %v1741_v4 }
  0x95   :  { %1345 = vmatpush3.msra.mxu1 %v1851_v47  ;;  %1357 = vmatprep.subr.mxu0 %v1670_v0  ;;  %v513_v50 = vmul.f32 2.0, %v1067_v49  ;;  %v616_v52 = vadd.f32 %v1877_v58, %v614_v48  ;;  %vm512_vm4 = vcmp.gt.f32.partialorder %v1067_v49, 0.0 }
  0x96   :  { %1346 = vmatprep.subr.mxu1 %v1670_v0  ;;  %1358 = vmatpush3.msra.mxu0 %v1746_v5 }
  0x97   :  { %1347 = vmatpush3.msra.mxu1 %v1858_v51  ;;  %1359 = vmatprep.subr.mxu0 %v1670_v0  ;;  %1509 = vtanh.f32 %v513_v50 }
  0x98   :  { %1348 = vmatprep.subr.mxu1 %v1670_v0  ;;  %1360 = vmatpush3.msra.mxu0 %v1754_v7 }
  0x99   :  { %1349 = vmatpush3.msra.mxu1 %v1868_v54  ;;  %1361 = vmatprep.subr.mxu0 %v1670_v0 }
  0x9a   :  { %1362 = vmatpush3.msra.mxu0 %v1763_v9  ;;  %1388 = vmatprep.subr.mxu1 %v1670_v0 }
  0x9b   :  { %1363 = vmatprep.subr.mxu0 %v1670_v0  ;;  %1385 = vmatprep.mubr.msk.f32.mxu0 %vm1671_vm0, %v1670_v0 }
  0x9c   :  { %1364 = vmatpush3.msra.mxu0 %v1775_v15 }
  0x9d   :  { %1365 = vmatprep.subr.mxu0 %v1670_v0 }
  0x9e   :  { %1366 = vmatpush3.msra.mxu0 %v1791_v21 }
  0x9f   :  { %1367 = vmatprep.subr.mxu0 %v1670_v0 }
  0xa0   :  { %1368 = vmatpush3.msra.mxu0 %v1801_v24 }
  0xa1   :  { %1369 = vmatprep.subr.mxu0 %v1670_v0 }
  0xa2   :  { %1370 = vmatpush3.msra.mxu0 %v1809_v29 }
  0xa3   :  { %1371 = vmatprep.subr.mxu0 %v1670_v0 }
  0xa4   :  { %v1510_v53 = vpop.eup %1509  ;;  %1372 = vmatpush3.msra.mxu0 %v1817_v32 }
  0xa5   :  { %v515_v55 = vmul.f32 0.5, %v1510_v53  ;;  %1373 = vmatprep.subr.mxu0 %v1670_v0 }
  0xa6   :  { %1374 = vmatpush3.msra.mxu0 %v1824_v37 }
  0xa7   :  { %v516_v56 = vsel %vm512_vm4, 1.0, %v515_v55  ;;  %1375 = vmatprep.subr.mxu0 %v1670_v0 }
  0xa8   :  { %1351 = vmatmul.mubr.f32.vlgmr.msra.gmra.mxu1 %v516_v56  ;;  %v617_v57 = vsub.f32 %v616_v52, %v516_v56  ;;  %1376 = vmatpush3.msra.mxu0 %v1833_v40 }
  0xa9   :  { %1377 = vmatprep.subr.mxu0 %v1670_v0  ;;  %1389 = vmatpush3.msra.mxu1 %v1739_v3 }
  0xaa   :  { %v721_v58 = vmul.f32 %v617_v57, %v1783_v18  ;;  %1378 = vmatpush3.msra.mxu0 %v1843_v45  ;;  %1390 = vmatprep.subr.mxu1 %v1670_v0  ;;  %v1069_v59 = vadd.f32 -1.0, %v617_v57 }
  0xab   :  { %1379 = vmatprep.subr.mxu0 %v1670_v0  ;;  %1391 = vmatpush3.msra.mxu1 %v1741_v4 }
  0xac   :  { %1380 = vmatpush3.msra.mxu0 %v1851_v47  ;;  %1392 = vmatprep.subr.mxu1 %v1670_v0  ;;  %v620_v60 = vmul.f32 2.0, %v1069_v59  ;;  %v723_v61 = vadd.f32 %v1888_v1, %v721_v58  ;;  %vm619_vm5 = vcmp.gt.f32.partialorder %v1069_v59, 0.0 }
  0xad   :  { %1381 = vmatprep.subr.mxu0 %v1670_v0  ;;  %1393 = vmatpush3.msra.mxu1 %v1746_v5 }
  0xae   :  { %1382 = vmatpush3.msra.mxu0 %v1858_v51  ;;  %1394 = vmatprep.subr.mxu1 %v1670_v0  ;;  %1511 = vtanh.f32 %v620_v60 }
  0xaf   :  { %1383 = vmatprep.subr.mxu0 %v1670_v0  ;;  %1395 = vmatpush3.msra.mxu1 %v1754_v7 }
  0xb0   :  { %1384 = vmatpush3.msra.mxu0 %v1868_v54  ;;  %1396 = vmatprep.subr.mxu1 %v1670_v0 }
  0xb1   :  { %1397 = vmatpush3.msra.mxu1 %v1763_v9  ;;  %1423 = vmatprep.subr.mxu0 %v1670_v0 }
  0xb2   :  { %1398 = vmatprep.subr.mxu1 %v1670_v0  ;;  %1420 = vmatprep.mubr.msk.f32.mxu1 %vm1671_vm0, %v1670_v0 }
  0xb3   :  { %1399 = vmatpush3.msra.mxu1 %v1775_v15 }
  0xb4   :  { %1400 = vmatprep.subr.mxu1 %v1670_v0 }
  0xb5   :  { %1401 = vmatpush3.msra.mxu1 %v1791_v21 }
  0xb6   :  { %1402 = vmatprep.subr.mxu1 %v1670_v0 }
  0xb7   :  { %1403 = vmatpush3.msra.mxu1 %v1801_v24 }
  0xb8   :  { %1404 = vmatprep.subr.mxu1 %v1670_v0 }
  0xb9   :  { %1405 = vmatpush3.msra.mxu1 %v1809_v29 }
  0xba   :  { %1406 = vmatprep.subr.mxu1 %v1670_v0 }
  0xbb   :  { %v1512_v62 = vpop.eup %1511  ;;  %1407 = vmatpush3.msra.mxu1 %v1817_v32 }
  0xbc   :  { %v622_v63 = vmul.f32 0.5, %v1512_v62  ;;  %1408 = vmatprep.subr.mxu1 %v1670_v0 }
  0xbd   :  { %1409 = vmatpush3.msra.mxu1 %v1824_v37 }
  0xbe   :  { %v623_v1 = vsel %vm619_vm5, 1.0, %v622_v63  ;;  %1410 = vmatprep.subr.mxu1 %v1670_v0 }
  0xbf   :  { %1386 = vmatmul.mubr.f32.vlgmr.msra.gmra.mxu0 %v623_v1  ;;  %v724_v2 = vsub.f32 %v723_v61, %v623_v1  ;;  %1411 = vmatpush3.msra.mxu1 %v1833_v40 }
  0xc0   :  { %1412 = vmatprep.subr.mxu1 %v1670_v0  ;;  %1424 = vmatpush3.msra.mxu0 %v1739_v3 }
  0xc1   :  { %v828_v8 = vmul.f32 %v724_v2, %v1783_v18  ;;  %1413 = vmatpush3.msra.mxu1 %v1843_v45  ;;  %1425 = vmatprep.subr.mxu0 %v1670_v0  ;;  %v1071_v10 = vadd.f32 -1.0, %v724_v2 }
  0xc2   :  { %1414 = vmatprep.subr.mxu1 %v1670_v0  ;;  %1426 = vmatpush3.msra.mxu0 %v1741_v4 }
  0xc3   :  { %1415 = vmatpush3.msra.mxu1 %v1851_v47  ;;  %1427 = vmatprep.subr.mxu0 %v1670_v0  ;;  %v727_v11 = vmul.f32 2.0, %v1071_v10  ;;  %v830_v13 = vadd.f32 %v1893_v16, %v828_v8  ;;  %vm726_vm6 = vcmp.gt.f32.partialorder %v1071_v10, 0.0 }
  0xc4   :  { %1416 = vmatprep.subr.mxu1 %v1670_v0  ;;  %1428 = vmatpush3.msra.mxu0 %v1746_v5 }
  0xc5   :  { %1417 = vmatpush3.msra.mxu1 %v1858_v51  ;;  %1429 = vmatprep.subr.mxu0 %v1670_v0  ;;  %1513 = vtanh.f32 %v727_v11 }
  0xc6   :  { %1418 = vmatprep.subr.mxu1 %v1670_v0  ;;  %1430 = vmatpush3.msra.mxu0 %v1754_v7 }
  0xc7   :  { %1419 = vmatpush3.msra.mxu1 %v1868_v54  ;;  %1431 = vmatprep.subr.mxu0 %v1670_v0 }
  0xc8   :  { %1432 = vmatpush3.msra.mxu0 %v1763_v9  ;;  %1458 = vmatprep.subr.mxu1 %v1670_v0 }
  0xc9   :  { %1433 = vmatprep.subr.mxu0 %v1670_v0  ;;  %1455 = vmatprep.mubr.msk.f32.mxu0 %vm1671_vm0, %v1670_v0 }
  0xca   :  { %1434 = vmatpush3.msra.mxu0 %v1775_v15 }
  0xcb   :  { %1435 = vmatprep.subr.mxu0 %v1670_v0 }
  0xcc   :  { %1436 = vmatpush3.msra.mxu0 %v1791_v21 }
  0xcd   :  { %1437 = vmatprep.subr.mxu0 %v1670_v0 }
  0xce   :  { %1438 = vmatpush3.msra.mxu0 %v1801_v24 }
  0xcf   :  { %1439 = vmatprep.subr.mxu0 %v1670_v0 }
  0xd0   :  { %1440 = vmatpush3.msra.mxu0 %v1809_v29 }
  0xd1   :  { %1441 = vmatprep.subr.mxu0 %v1670_v0 }
  0xd2   :  { %v1514_v14 = vpop.eup %1513  ;;  %1442 = vmatpush3.msra.mxu0 %v1817_v32 }
  0xd3   :  { %v729_v16 = vmul.f32 0.5, %v1514_v14  ;;  %1443 = vmatprep.subr.mxu0 %v1670_v0 }
  0xd4   :  { %1444 = vmatpush3.msra.mxu0 %v1824_v37 }
  0xd5   :  { %v730_v19 = vsel %vm726_vm6, 1.0, %v729_v16  ;;  %1445 = vmatprep.subr.mxu0 %v1670_v0 }
  0xd6   :  { %1421 = vmatmul.mubr.f32.vlgmr.msra.gmra.mxu1 %v730_v19  ;;  %v831_v20 = vsub.f32 %v830_v13, %v730_v19  ;;  %1446 = vmatpush3.msra.mxu0 %v1833_v40 }
  0xd7   :  { %1447 = vmatprep.subr.mxu0 %v1670_v0  ;;  %1459 = vmatpush3.msra.mxu1 %v1739_v3 }
  0xd8   :  { %v935_v22 = vmul.f32 %v831_v20, %v1783_v18  ;;  %1448 = vmatpush3.msra.mxu0 %v1843_v45  ;;  %1460 = vmatprep.subr.mxu1 %v1670_v0  ;;  %v1073_v25 = vadd.f32 -1.0, %v831_v20 }
  0xd9   :  { %1449 = vmatprep.subr.mxu0 %v1670_v0  ;;  %1461 = vmatpush3.msra.mxu1 %v1741_v4 }
  0xda   :  { %1450 = vmatpush3.msra.mxu0 %v1851_v47  ;;  %1462 = vmatprep.subr.mxu1 %v1670_v0  ;;  %v834_v26 = vmul.f32 2.0, %v1073_v25  ;;  %v937_v27 = vadd.f32 %v1906_v30, %v935_v22  ;;  %vm833_vm7 = vcmp.gt.f32.partialorder %v1073_v25, 0.0 }
  0xdb   :  { %1451 = vmatprep.subr.mxu0 %v1670_v0  ;;  %1463 = vmatpush3.msra.mxu1 %v1746_v5 }
  0xdc   :  { %1452 = vmatpush3.msra.mxu0 %v1858_v51  ;;  %1464 = vmatprep.subr.mxu1 %v1670_v0  ;;  %1515 = vtanh.f32 %v834_v26 }
  0xdd   :  { %1453 = vmatprep.subr.mxu0 %v1670_v0  ;;  %1465 = vmatpush3.msra.mxu1 %v1754_v7 }
  0xde   :  { %1454 = vmatpush3.msra.mxu0 %v1868_v54  ;;  %1466 = vmatprep.subr.mxu1 %v1670_v0 }
  0xdf   :  { %1467 = vmatpush3.msra.mxu1 %v1763_v9  ;;  %1490 = vmatprep.mubr.msk.f32.mxu1 %vm1671_vm0, %v1670_v0 }
  0xe0   :  { %1468 = vmatprep.subr.mxu1 %v1670_v0 }
  0xe1   :  { %1469 = vmatpush3.msra.mxu1 %v1775_v15 }
  0xe2   :  { %1470 = vmatprep.subr.mxu1 %v1670_v0 }
  0xe3   :  { %1471 = vmatpush3.msra.mxu1 %v1791_v21 }
  0xe4   :  { %1472 = vmatprep.subr.mxu1 %v1670_v0 }
  0xe5   :  { %1473 = vmatpush3.msra.mxu1 %v1801_v24 }
  0xe6   :  { %1474 = vmatprep.subr.mxu1 %v1670_v0 }
  0xe7   :  { %1475 = vmatpush3.msra.mxu1 %v1809_v29  ;;  %v108_v29 = vld [vmem:[#allocation11] sm:$0x1] }
  0xe8   :  { %1476 = vmatprep.subr.mxu1 %v1670_v0 }
  0xe9   :  { %v1516_v3 = vpop.eup %1515  ;;  %1477 = vmatpush3.msra.mxu1 %v1817_v32  ;;  %v109_v32 = vsub.f32 1.0, %v108_v29 }
  0xea   :  { %v836_v4 = vmul.f32 0.5, %v1516_v3  ;;  %1478 = vmatprep.subr.mxu1 %v1670_v0 }
  0xeb   :  { %1479 = vmatpush3.msra.mxu1 %v1824_v37  ;;  %v110_v37 = vld [vmem:[#allocation13] sm:$0x1] }
  0xec   :  { %v837_v5 = vsel %vm833_vm7, 1.0, %v836_v4  ;;  %1480 = vmatprep.subr.mxu1 %v1670_v0 }
  0xed   :  { %1456 = vmatmul.mubr.f32.vlgmr.msra.gmra.mxu0 %v837_v5  ;;  %v938_v7 = vsub.f32 %v937_v27, %v837_v5  ;;  %1481 = vmatpush3.msra.mxu1 %v1833_v40  ;;  %v2116_v40 = vrot.slane %v108_v29, %v1749_v6 }
  0xee   :  { %1482 = vmatprep.subr.mxu1 %v1670_v0 }
  0xef   :  { %v1075_v9 = vadd.f32 -1.0, %v938_v7  ;;  %1483 = vmatpush3.msra.mxu1 %v1843_v45  ;;  %v111_v45 = vsub.f32 1.0, %v110_v37 }
  0xf0   :  { %1484 = vmatprep.subr.mxu1 %v1670_v0 }
  0xf1   :  { %v941_v15 = vmul.f32 2.0, %v1075_v9  ;;  %1485 = vmatpush3.msra.mxu1 %v1851_v47  ;;  %vm940_vm8 = vcmp.gt.f32.partialorder %v1075_v9, 0.0  ;;  %v2119_v47 = vrot.slane %v109_v32, %v1749_v6  ;;  %v2127_v12 = vrot.slane %v111_v45, %v1749_v6 }
  0xf2   :  { %1486 = vmatprep.subr.mxu1 %v1670_v0 }
  0xf3   :  { %1517 = vtanh.f32 %v941_v15  ;;  %1487 = vmatpush3.msra.mxu1 %v1858_v51  ;;  %v249_v51 = vmul.f32 0.0, %v2116_v40 }
  0xf4   :  { %1488 = vmatprep.subr.mxu1 %v1670_v0  ;;  %v2123_v0 = vrot.slane %v110_v37, %v1749_v6 }
  0xf5   :  { %1489 = vmatpush3.msra.mxu1 %v1868_v54  ;;  %v101_v54 = vld [vmem:[#allocation16] sm:$0xff] }
  0xf6   :  { %v264_v33 = vmul.f32 %v2123_v0, %v101_v54 }
 0x100   :  { %v1518_v18 = vpop.eup %1517 }
 0x101   :  { %v943_v21 = vmul.f32 0.5, %v1518_v18 }
 0x103   :  { %v944_v24 = vsel %vm940_vm8, 1.0, %v943_v21 }
 0x104   :  { %1491 = vmatmul.mubr.f32.vlgmr.msra.gmra.mxu1 %v944_v24 }
 0x123   :  { %v239_v28 = vpop.f32.mrf.mxu0 }
 0x124   :  { %v256_v30 = vmul.f32 %v2119_v47, %v239_v28 }
 0x125   :  { %v1247_v17 = vpop.f32.mrf.mxu0 }
 0x126   :  { %v257_v31 = vadd.f32 %v256_v30, %v249_v51 }
 0x128   :  { %v271_v34 = vmul.f32 %v2127_v12, %v257_v31  ;;  %v373_v39 = vmul.f32 %v257_v31, %v2116_v40 }
 0x12a   :  { %v272_v35 = vadd.f32 %v271_v34, %v264_v33 }
 0x12c   :  { %v1062_v23 = vadd.f32 -1.0, %v272_v35  ;;  %v376_v46 = vmul.f32 %v272_v35, %v2123_v0 }
 0x12e   :  { %v276_v36 = vmul.f32 2.0, %v1062_v23  ;;  %vm275_vm9 = vcmp.gt.f32.partialorder %v1062_v23, 0.0 }
 0x130   :  { %1519 = vtanh.f32 %v276_v36 }
 0x13a   :  { %v369_v38 = vpop.f32.mrf.mxu1 }
 0x13b   :  { %v374_v41 = vmul.f32 %v369_v38, %v2119_v47 }
 0x13c   :  { %v1282_v42 = vpop.f32.mrf.mxu1 }
 0x13d   :  { %v1520_v43 = vpop.eup %1519  ;;  %v375_v44 = vadd.f32 %v374_v41, %v373_v39 }
 0x13e   :  { %v278_v6 = vmul.f32 0.5, %v1520_v43 }
 0x13f   :  { %v377_v48 = vmul.f32 %v375_v44, %v2127_v12  ;;  %v480_v57 = vmul.f32 %v375_v44, %v2116_v40 }
 0x140   :  { %v279_v50 = vsel %vm275_vm9, 1.0, %v278_v6 }
 0x141   :  { %v378_v49 = vadd.f32 %v377_v48, %v376_v46  ;;  %v286_v10 = vmul.f32 0.0, %v279_v50 }
 0x143   :  { %v379_v52 = vsub.f32 %v378_v49, %v279_v50 }
 0x145   :  { %v1064_v53 = vadd.f32 -1.0, %v379_v52  ;;  %v483_v62 = vmul.f32 %v379_v52, %v2123_v0 }
 0x147   :  { %v382_v55 = vmul.f32 2.0, %v1064_v53  ;;  %vm381_vm10 = vcmp.gt.f32.partialorder %v1064_v53, 0.0 }
 0x149   :  { %1521 = vtanh.f32 %v382_v55 }
 0x151   :  { %v476_v56 = vpop.f32.mrf.mxu0 }
 0x152   :  { %v481_v58 = vmul.f32 %v476_v56, %v2119_v47 }
 0x153   :  { %v1317_v59 = vpop.f32.mrf.mxu0 }
 0x154   :  { %v482_v60 = vadd.f32 %v481_v58, %v480_v57 }
 0x156   :  { %v1522_v61 = vpop.eup %1521  ;;  %v484_v63 = vmul.f32 %v482_v60, %v2127_v12  ;;  %v587_v22 = vmul.f32 %v482_v60, %v2116_v40 }
 0x157   :  { %v384_v1 = vmul.f32 0.5, %v1522_v61 }
 0x158   :  { %v485_v2 = vadd.f32 %v484_v63, %v483_v62 }
 0x159   :  { %v385_v8 = vsel %vm381_vm10, 1.0, %v384_v1 }
 0x15a   :  { %v393_v11 = vmul.f32 0.0, %v385_v8  ;;  %v486_v13 = vsub.f32 %v485_v2, %v385_v8 }
 0x15c   :  { %v394_v14 = vadd.f32 %v393_v11, %v286_v10  ;;  %v1066_v16 = vadd.f32 -1.0, %v486_v13  ;;  %v590_v4 = vmul.f32 %v486_v13, %v2123_v0 }
 0x15e   :  { %v489_v19 = vmul.f32 2.0, %v1066_v16  ;;  %vm488_vm11 = vcmp.gt.f32.partialorder %v1066_v16, 0.0 }
 0x160   :  { %1523 = vtanh.f32 %v489_v19 }
 0x168   :  { %v583_v20 = vpop.f32.mrf.mxu1 }
 0x169   :  { %v588_v25 = vmul.f32 %v583_v20, %v2119_v47 }
 0x16a   :  { %v1352_v26 = vpop.f32.mrf.mxu1 }
 0x16b   :  { %v589_v27 = vadd.f32 %v588_v25, %v587_v22 }
 0x16d   :  { %v1524_v3 = vpop.eup %1523  ;;  %v591_v5 = vmul.f32 %v589_v27, %v2127_v12  ;;  %v694_v45 = vmul.f32 %v589_v27, %v2116_v40 }
 0x16e   :  { %v491_v7 = vmul.f32 0.5, %v1524_v3 }
 0x16f   :  { %v592_v9 = vadd.f32 %v591_v5, %v590_v4 }
 0x170   :  { %v492_v15 = vsel %vm488_vm11, 1.0, %v491_v7 }
 0x171   :  { %v500_v18 = vmul.f32 0.0, %v492_v15  ;;  %v593_v21 = vsub.f32 %v592_v9, %v492_v15 }
 0x173   :  { %v501_v24 = vadd.f32 %v500_v18, %v394_v14  ;;  %v1068_v29 = vadd.f32 -1.0, %v593_v21  ;;  %v697_v17 = vmul.f32 %v593_v21, %v2123_v0 }
 0x175   :  { %v596_v32 = vmul.f32 2.0, %v1068_v29  ;;  %vm595_vm12 = vcmp.gt.f32.partialorder %v1068_v29, 0.0 }
 0x177   :  { %1525 = vtanh.f32 %v596_v32 }
 0x17f   :  { %v690_v37 = vpop.f32.mrf.mxu0 }
 0x180   :  { %v695_v51 = vmul.f32 %v690_v37, %v2119_v47 }
 0x181   :  { %v1387_v54 = vpop.f32.mrf.mxu0 }
 0x182   :  { %v696_v28 = vadd.f32 %v695_v51, %v694_v45 }
 0x184   :  { %v1526_v30 = vpop.eup %1525  ;;  %v698_v31 = vmul.f32 %v696_v28, %v2127_v12  ;;  %v801_v43 = vmul.f32 %v696_v28, %v2116_v40 }
 0x185   :  { %v598_v33 = vmul.f32 0.5, %v1526_v30 }
 0x186   :  { %v699_v34 = vadd.f32 %v698_v31, %v697_v17 }
 0x187   :  { %v599_v35 = vsel %vm595_vm12, 1.0, %v598_v33 }
 0x188   :  { %v607_v23 = vmul.f32 0.0, %v599_v35  ;;  %v700_v36 = vsub.f32 %v699_v34, %v599_v35 }
 0x18a   :  { %v1070_v38 = vadd.f32 -1.0, %v700_v36  ;;  %v608_v39 = vadd.f32 %v607_v23, %v501_v24  ;;  %v804_v49 = vmul.f32 %v700_v36, %v2123_v0 }
 0x18c   :  { %v703_v41 = vmul.f32 2.0, %v1070_v38  ;;  %vm702_vm13 = vcmp.gt.f32.partialorder %v1070_v38, 0.0 }
 0x18e   :  { %1527 = vtanh.f32 %v703_v41 }
 0x196   :  { %v797_v42 = vpop.f32.mrf.mxu1 }
 0x197   :  { %v802_v44 = vmul.f32 %v797_v42, %v2119_v47 }
 0x198   :  { %v1422_v6 = vpop.f32.mrf.mxu1 }
 0x199   :  { %v803_v46 = vadd.f32 %v802_v44, %v801_v43 }
 0x19b   :  { %v1528_v48 = vpop.eup %1527  ;;  %v805_v50 = vmul.f32 %v803_v46, %v2127_v12  ;;  %v908_v60 = vmul.f32 %v803_v46, %v2116_v40 }
 0x19c   :  { %v705_v52 = vmul.f32 0.5, %v1528_v48 }
 0x19d   :  { %v806_v53 = vadd.f32 %v805_v50, %v804_v49 }
 0x19e   :  { %v706_v55 = vsel %vm702_vm13, 1.0, %v705_v52 }
 0x19f   :  { %v807_v56 = vsub.f32 %v806_v53, %v706_v55  ;;  %v714_v29 = vmul.f32 0.0, %v706_v55 }
 0x1a1   :  { %v1072_v57 = vadd.f32 -1.0, %v807_v56  ;;  %v911_v2 = vmul.f32 %v807_v56, %v2123_v0  ;;  %v715_v37 = vadd.f32 %v714_v29, %v608_v39 }
 0x1a3   :  { %v810_v58 = vmul.f32 2.0, %v1072_v57  ;;  %vm809_vm14 = vcmp.gt.f32.partialorder %v1072_v57, 0.0 }
 0x1a5   :  { %1529 = vtanh.f32 %v810_v58 }
 0x1ad   :  { %v904_v59 = vpop.f32.mrf.mxu0 }
 0x1ae   :  { %v909_v61 = vmul.f32 %v904_v59, %v2119_v47 }
 0x1af   :  { %v1457_v62 = vpop.f32.mrf.mxu0 }
 0x1b0   :  { %v910_v63 = vadd.f32 %v909_v61, %v908_v60 }
 0x1b2   :  { %v1530_v1 = vpop.eup %1529  ;;  %v912_v8 = vmul.f32 %v910_v63, %v2127_v12  ;;  %v1015_v22 = vmul.f32 %v910_v63, %v2116_v40 }
 0x1b3   :  { %v812_v10 = vmul.f32 0.5, %v1530_v1 }
 0x1b4   :  { %v913_v11 = vadd.f32 %v912_v8, %v911_v2 }
 0x1b5   :  { %v813_v13 = vsel %vm809_vm14, 1.0, %v812_v10 }
 0x1b6   :  { %v914_v14 = vsub.f32 %v913_v11, %v813_v13  ;;  %v821_v32 = vmul.f32 0.33333334, %v813_v13 }
 0x1b8   :  { %v1074_v16 = vadd.f32 -1.0, %v914_v14  ;;  %v1018_v4 = vmul.f32 %v914_v14, %v2123_v0  ;;  %v822_v51 = vadd.f32 %v821_v32, %v715_v37 }
 0x1ba   :  { %v917_v19 = vmul.f32 2.0, %v1074_v16  ;;  %vm916_vm15 = vcmp.gt.f32.partialorder %v1074_v16, 0.0 }
 0x1bc   :  { %1531 = vtanh.f32 %v917_v19 }
 0x1c4   :  { %v1011_v20 = vpop.f32.mrf.mxu1 }
 0x1c5   :  { %v1016_v25 = vmul.f32 %v1011_v20, %v2119_v47 }
 0x1c6   :  { %v1492_v26 = vpop.f32.mrf.mxu1 }
 0x1c7   :  { %v1017_v27 = vadd.f32 %v1016_v25, %v1015_v22 }
 0x1c9   :  { %v1532_v3 = vpop.eup %1531  ;;  %v1019_v5 = vmul.f32 %v1017_v27, %v2127_v12 }
 0x1ca   :  { %v919_v7 = vmul.f32 0.5, %v1532_v3 }
 0x1cb   :  { %v1020_v9 = vadd.f32 %v1019_v5, %v1018_v4 }
 0x1cc   :  { %v920_v15 = vsel %vm916_vm15, 1.0, %v919_v7 }
 0x1cd   :  { %v1021_v18 = vsub.f32 %v1020_v9, %v920_v15  ;;  %v928_v47 = vmul.f32 0.33333334, %v920_v15 }
 0x1cf   :  { %v1076_v21 = vadd.f32 -1.0, %v1021_v18  ;;  %v929_v0 = vadd.f32 %v928_v47, %v822_v51 }
 0x1d1   :  { %v1024_v24 = vmul.f32 2.0, %v1076_v21  ;;  %vm1023_vm0 = vcmp.gt.f32.partialorder %v1076_v21, 0.0 }
 0x1d3   :  { %1533 = vtanh.f32 %v1024_v24 }
 0x1e0   :  { %v1534_v40 = vpop.eup %1533 }
 0x1e1   :  { %v1026_v45 = vmul.f32 0.5, %v1534_v40 }
 0x1e3   :  { %v1027_v54 = vsel %vm1023_vm0, 1.0, %v1026_v45 }
 0x1e4   :  { %v1035_v12 = vmul.f32 0.33333334, %v1027_v54 }
 0x1e6   :  { %v1036_v28 = vadd.f32 %v1035_v12, %v929_v0 }
 0x1e8   :  { %1043 = vst [vmem:[#allocation17] sm:$0xff] %v1036_v28 }
 0x1e9   :  { %1646 = shalt.err (!%p1643_p1)
}
 0x1ea   :  { %1053 = dma.vmem_to_hbm [thread:$0]  %s1051_s11, 128, %s2170_s8, [#allocation10]  }
 0x1eb   :  { %1661 = dma.done.wait [#allocation10], 128  }
 0x1ec   :  { %1662 = vsyncadd [#allocation10], 4294967168 }
 0x1ed   :  { %1057 = vsyncpa [#allocation9], 1 }
 0x1ee   :  { %1058 = vsyncpa [#allocation12], 1 }
 0x1ef   :  { %1059 = vsyncpa [#allocation15], 1 }
 0x1f0   :  { %1060 = vsyncpa [#allocation10], 1 }

</bundles_post_ra>
